<compile_context>
chip_gen: v7x
topology: tpu7x:2x2x1
jax: 0.10.0
libtpu: 0.0.40
codegen_flags: <defaults>
</compile_context>

<pallas_src>
import functools
import math

import jax
import jax.numpy as jnp
from jax.experimental import pallas as pl
from jax.experimental.pallas import tpu as pltpu

_BN_EPS = 1e-5


def _vmem_limit_bytes():
    """~3/4 of physical VMEM, capped to [32, 96] MiB (v5e/v6e -> 96 MiB, v7x -> 48 MiB)."""
    try:
        cap = pltpu.get_tpu_info().vmem_capacity_bytes
    except Exception:
        cap = 64 * 1024 * 1024
    return int(min(max(cap * 3 // 4, 32 * 1024 * 1024), 96 * 1024 * 1024))


_VMEM_LIMIT = _vmem_limit_bytes()


# ------------------------------- helpers --------------------------------------

def _round_up(x, m):
    return ((x + m - 1) // m) * m


def _pick_tile(dim, prefs):
    """Largest preferred tile that evenly divides `dim`, else the full dim."""
    for p in prefs:
        if dim >= p and dim % p == 0:
            return p
    return dim


def _pad2d(w, rows, cols):
    r, c = w.shape
    if r == rows and c == cols:
        return w
    return jnp.pad(w, ((0, rows - r), (0, cols - c)))


def _pad1d(b, n):
    return b if b.shape[0] == n else jnp.pad(b, (0, n - b.shape[0]))


def _pad_conv_w(w, cin_p, cout_p):
    kh, kw, ci, co = w.shape
    if ci == cin_p and co == cout_p:
        return w
    return jnp.pad(w, ((0, 0), (0, 0), (0, cin_p - ci), (0, cout_p - co)))


# ----------------------------- Pallas kernels ----------------------------------

def _gemm_kernel(*refs, n_lhs, relu):
    """out = maybe_relu(sum_t lhs_t @ w_t + b); f32 accumulation, no K grid axis."""
    b_ref = refs[2 * n_lhs]
    o_ref = refs[2 * n_lhs + 1]
    acc = jnp.zeros(o_ref.shape, jnp.float32)
    for t in range(n_lhs):
        acc = acc + jnp.dot(refs[2 * t][...], refs[2 * t + 1][...],
                            preferred_element_type=jnp.float32)
    acc = acc + b_ref[...]
    if relu:
        acc = jnp.maximum(acc, 0.0)
    o_ref[...] = acc.astype(o_ref.dtype)


def _conv3x3_kernel(x_ref, w_ref, b_ref, o_ref, *, relu):
    """3x3/stride-1/pad-1 conv on one whole padded image: 9 shifted (H*W,Cin)@(Cin,tn)."""
    h, wd, tn = o_ref.shape
    cin = x_ref.shape[-1]
    acc = jnp.zeros((h * wd, tn), jnp.float32)
    for di in range(3):                                   # static unroll over the 9 taps
        for dj in range(3):
            lhs = x_ref[di:di + h, dj:dj + wd, :].reshape(h * wd, cin)
            acc = acc + jnp.dot(lhs, w_ref[di, dj, :, :],
                                preferred_element_type=jnp.float32)
    acc = acc + b_ref[0, :]
    if relu:
        acc = jnp.maximum(acc, 0.0)
    o_ref[...] = acc.reshape(h, wd, tn).astype(o_ref.dtype)


# ----------------------------- kernel wrappers ---------------------------------

def _matmul_fused(operands, bias, *, relu, out_dtype):
    """maybe_relu(sum_t lhs_t @ w_t + bias) on a (M, N) parallel grid (bf16 MXU operands).

    operands: list of (lhs (M, K_t), w (K_t, N)) pairs sharing the same M and N.
    """
    m = operands[0][0].shape[0]
    n_p = operands[0][1].shape[1]
    tm = min(512, _round_up(m, 8))
    tn = _pick_tile(n_p, (512, 256, 128))

    in_specs, args = [], []
    for lhs, w in operands:
        k = lhs.shape[1]
        in_specs.append(pl.BlockSpec((tm, k), lambda i, j: (i, 0)))
        in_specs.append(pl.BlockSpec((k, tn), lambda i, j: (0, j)))
        args.append(lhs if lhs.dtype == jnp.bfloat16 else lhs.astype(jnp.bfloat16))
        args.append(w.astype(jnp.bfloat16))
    in_specs.append(pl.BlockSpec((1, tn), lambda i, j: (0, j)))
    args.append(bias.reshape(1, n_p).astype(jnp.float32))

    return pl.pallas_call(
        functools.partial(_gemm_kernel, n_lhs=len(operands), relu=relu),
        out_shape=jax.ShapeDtypeStruct((m, n_p), out_dtype),
        grid_spec=pltpu.PrefetchScalarGridSpec(
            num_scalar_prefetch=0,
            grid=(pl.cdiv(m, tm), n_p // tn),
            in_specs=in_specs,
            out_specs=pl.BlockSpec((tm, tn), lambda i, j: (i, j)),
        ),
        compiler_params=pltpu.CompilerParams(
            dimension_semantics=("parallel", "parallel"),
            vmem_limit_bytes=_VMEM_LIMIT,
        ),
    )(*args)


def _conv3x3(x, w, b, *, relu):
    """3x3 / stride-1 / pad-1 conv; one whole padded NHWC image per grid step."""
    n, h, wd, cin = x.shape
    cout = w.shape[-1]
    tn = _pick_tile(cout, (512, 256, 128))
    xp = jnp.pad(x, ((0, 0), (1, 1), (1, 1), (0, 0)))       # bf16 halo pad (no cast pass)
    hp, wp = h + 2, wd + 2

    return pl.pallas_call(
        functools.partial(_conv3x3_kernel, relu=relu),
        out_shape=jax.ShapeDtypeStruct((n, h, wd, cout), jnp.bfloat16),
        grid_spec=pltpu.PrefetchScalarGridSpec(
            num_scalar_prefetch=0,
            grid=(n, cout // tn),
            in_specs=[
                pl.BlockSpec((None, hp, wp, cin), lambda ni, j: (ni, 0, 0, 0)),
                pl.BlockSpec((3, 3, cin, tn), lambda ni, j: (0, 0, 0, j)),
                pl.BlockSpec((1, tn), lambda ni, j: (0, j)),
            ],
            out_specs=pl.BlockSpec((None, h, wd, tn), lambda ni, j: (ni, 0, 0, j)),
        ),
        compiler_params=pltpu.CompilerParams(
            dimension_semantics=("parallel", "parallel"),
            vmem_limit_bytes=_VMEM_LIMIT,
        ),
    )(xp, w.astype(jnp.bfloat16), b.reshape(1, cout).astype(jnp.float32))


# ----------------------------- BN folding & forward ----------------------------

def _bn_scale_shift(bn):
    inv = bn["gamma"] / jnp.sqrt(bn["var"] + _BN_EPS)
    return inv, bn["beta"] - bn["mean"] * inv


def _fold_bn(conv, bn):
    """Fold eval-mode BN into the conv weight/bias: bn(conv(x)) == x @ W' + b'."""
    scale, shift = _bn_scale_shift(bn)
    return conv["w"] * scale, conv["b"] * scale + shift


@functools.partial(jax.jit, static_argnames=("stride",))
def resnet_enc_block_forward(params, x_nchw, *, stride):
    # NCHW -> NHWC, bf16 activations end-to-end.
    x = jnp.transpose(x_nchw, (0, 2, 3, 1)).astype(jnp.bfloat16)
    xs = x[:, ::stride, ::stride, :]          # sampling sites of the 1x1 stride-s convs
    n, ho, wo, cin = xs.shape
    m = n * ho * wo
    xs2 = xs.reshape(m, cin)

    cmid = params["conv1"]["w"].shape[-1]
    cout = params["conv3"]["w"].shape[-1]
    cmid_p = _round_up(cmid, 128)             # lane-dense stores (N is a multiple of 128)
    cout_p = _round_up(cout, 128)

    # conv1 (1x1, stride) + bn1 + ReLU  -> bias+ReLU GEMM, BN folded, bf16 out.
    w1, b1 = _fold_bn(params["conv1"], params["bn1"])
    w1 = _pad2d(w1.reshape(cin, cmid), cin, cmid_p)
    b1 = _pad1d(b1, cmid_p)
    y = _matmul_fused([(xs2, w1)], b1, relu=True, out_dtype=jnp.bfloat16)
    y = y.reshape(n, ho, wo, cmid_p)

    # conv2 (3x3, pad 1) + bn2 + ReLU   -> whole-image shift-and-matmul conv, bf16 out.
    w2, b2 = _fold_bn(params["conv2"], params["bn2"])
    w2 = _pad_conv_w(w2, cmid_p, cmid_p)
    b2 = _pad1d(b2, cmid_p)
    y = _conv3x3(y, w2, b2, relu=True)
    y2 = y.reshape(m, cmid_p)

    # conv3 + conv_skip + bn_skip + residual add + ReLU fused into ONE dual-LHS GEMM:
    #   relu(bn_skip(conv3(y) + conv_skip(x))) == relu(y @ (W3*s) + x @ (Wsk*s) + b')
    scale, shift = _bn_scale_shift(params["bn_skip"])
    w3 = _pad2d(params["conv3"]["w"].reshape(cmid, cout) * scale, cmid_p, cout_p)
    wsk = _pad2d(params["conv_skip"]["w"].reshape(cin, cout) * scale, cin, cout_p)
    bf = _pad1d((params["conv3"]["b"] + params["conv_skip"]["b"]) * scale + shift, cout_p)
    out = _matmul_fused([(y2, w3), (xs2, wsk)], bf, relu=True, out_dtype=jnp.float32)

    out = out[:, :cout].reshape(n, ho, wo, cout)
    return jnp.transpose(out, (0, 3, 1, 2))   # NHWC -> NCHW


# ----------------------------- parameter init ----------------------------------

def _conv_init(key, kh, kw, cin, cout):
    k1, k2 = jax.random.split(key)
    bound = 1.0 / math.sqrt(kh * kw * cin)
    return {"w": jax.random.uniform(k1, (kh, kw, cin, cout), jnp.float32, -bound, bound),
            "b": jax.random.uniform(k2, (cout,), jnp.float32, -bound, bound)}


def _bn_init(key, c):
    k1, k2, k3, k4 = jax.random.split(key, 4)
    return {"gamma": 1.0 + 0.1 * jax.random.normal(k1, (c,), jnp.float32),
            "beta": 0.1 * jax.random.normal(k2, (c,), jnp.float32),
            "mean": 0.1 * jax.random.normal(k3, (c,), jnp.float32),
            "var": 1.0 + 0.2 * jax.random.uniform(k4, (c,), jnp.float32)}


def init_resnet_enc_block(key, in_channels, mid_channels, out_channels):
    ks = jax.random.split(key, 7)
    return {"conv1": _conv_init(ks[0], 1, 1, in_channels, mid_channels),
            "bn1": _bn_init(ks[1], mid_channels),
            "conv2": _conv_init(ks[2], 3, 3, mid_channels, mid_channels),
            "bn2": _bn_init(ks[3], mid_channels),
            "conv3": _conv_init(ks[4], 1, 1, mid_channels, out_channels),
            "conv_skip": _conv_init(ks[5], 1, 1, in_channels, out_channels),
            "bn_skip": _bn_init(ks[6], out_channels)}


# ----------------------------- pure-JAX reference ------------------------------

def _reference_forward(params, x_nchw, stride):
    def conv(x, p, s, pad):
        y = jax.lax.conv_general_dilated(
            x, p["w"], window_strides=(s, s),
            padding=[(pad, pad), (pad, pad)],
            dimension_numbers=("NHWC", "HWIO", "NHWC"))
        return y + p["b"]

    def bn(x, p):
        inv = p["gamma"] / jnp.sqrt(p["var"] + _BN_EPS)
        return (x - p["mean"]) * inv + p["beta"]

    x = jnp.transpose(x_nchw, (0, 2, 3, 1)).astype(jnp.float32)
    y = jax.nn.relu(bn(conv(x, params["conv1"], stride, 0), params["bn1"]))
    y = jax.nn.relu(bn(conv(y, params["conv2"], 1, 1), params["bn2"]))
    y = conv(y, params["conv3"], 1, 0)
    y = jax.nn.relu(bn(y + conv(x, params["conv_skip"], stride, 0), params["bn_skip"]))
    return jnp.transpose(y, (0, 3, 1, 2))


# --------------------------------- demo -----------------------------------------

if __name__ == "__main__":
    batch, in_ch, mid_ch, out_ch = 2, 16, 8, 32
    stride, hw = 2, 16

    key = jax.random.PRNGKey(0)
    pkey, xkey = jax.random.split(key)
    params = init_resnet_enc_block(pkey, in_ch, mid_ch, out_ch)
    x = jax.random.normal(xkey, (batch, in_ch, hw, hw), jnp.float32)

    out = resnet_enc_block_forward(params, x, stride=stride)
    out = jax.block_until_ready(out)

    assert out.shape == (batch, out_ch, hw // stride, hw // stride), out.shape
    assert bool(jnp.all(jnp.isfinite(out)))

    ref = _reference_forward(params, x, stride)
    assert bool(jnp.allclose(out, ref, atol=5e-2, rtol=5e-2)), \
        float(jnp.max(jnp.abs(out - ref)))

    print("KERNEL_OK")
</pallas_src>

<mosaic_0001>
module attributes {stable_mosaic.version = 11 : i64} {
  func.func @_gemm_kernel(%arg0: i32, %arg1: i32, %arg2: memref<128x16xbf16, #tpu.memory_space<vmem>>, %arg3: memref<16x128xbf16, #tpu.memory_space<vmem>>, %arg4: memref<1x128xf32, #tpu.memory_space<vmem>>, %arg5: memref<128x128xbf16, #tpu.memory_space<vmem>>) attributes {dimension_semantics = [#tpu.dimension_semantics<parallel>, #tpu.dimension_semantics<parallel>], iteration_bounds = array<i64: 1, 1>, scalar_prefetch = 0 : i64, scratch_operands = 0 : i64, tpu.core_type = #tpu.core_type<tc>, window_params = [{transform_indices = @transform_0, window_bounds = array<i64: 128, 16>}, {transform_indices = @transform_1, window_bounds = array<i64: 16, 128>}, {transform_indices = @transform_2, window_bounds = array<i64: 1, 128>}, {transform_indices = @transform_3, window_bounds = array<i64: 128, 128>}]} {
    %cst = arith.constant 0.000000e+00 : f32
    %0 = vector.broadcast %cst : f32 to vector<128x128xf32>
    %c0 = arith.constant 0 : index
    %c0_0 = arith.constant 0 : index
    %1 = vector.load %arg2[%c0, %c0_0] : memref<128x16xbf16, #tpu.memory_space<vmem>>, vector<128x16xbf16>
    %c0_1 = arith.constant 0 : index
    %c0_2 = arith.constant 0 : index
    %2 = vector.load %arg3[%c0_1, %c0_2] : memref<16x128xbf16, #tpu.memory_space<vmem>>, vector<16x128xbf16>
    %cst_3 = arith.constant dense<0.000000e+00> : vector<128x128xf32>
    %3 = tpu.matmul %1, %2, %cst_3 {dimension_numbers = #tpu.dot_dimension_numbers<[1], [0], [0], [1], [0, 0, 1, 1], [], []>} : vector<128x16xbf16>, vector<16x128xbf16>, vector<128x128xf32> -> vector<128x128xf32>
    %4 = arith.addf %0, %3 : vector<128x128xf32>
    %c0_4 = arith.constant 0 : index
    %c0_5 = arith.constant 0 : index
    %5 = vector.load %arg4[%c0_4, %c0_5] : memref<1x128xf32, #tpu.memory_space<vmem>>, vector<1x128xf32>
    %6 = vector.broadcast %5 : vector<1x128xf32> to vector<128x128xf32>
    %7 = arith.addf %4, %6 : vector<128x128xf32>
    %cst_6 = arith.constant 0.000000e+00 : f32
    %8 = vector.broadcast %cst_6 : f32 to vector<128x128xf32>
    %9 = arith.maximumf %7, %8 : vector<128x128xf32>
    %10 = arith.truncf %9 : vector<128x128xf32> to vector<128x128xbf16>
    %c0_7 = arith.constant 0 : index
    %c0_8 = arith.constant 0 : index
    %11 = vector.load %arg5[%c0_7, %c0_8] : memref<128x128xbf16, #tpu.memory_space<vmem>>, vector<128x128xbf16>
    tpu.vector_store %arg5[%c0_7, %c0_8], %10 {strides = array<i32>} : memref<128x128xbf16, #tpu.memory_space<vmem>>, vector<128x128xbf16>,
    return
  }
  func.func @transform_0(%arg0: i32, %arg1: i32) -> (i32, i32) {
    %c0_i32 = arith.constant 0 : i32
    %c0_i32_0 = arith.constant 0 : i32
    return %arg0, %c0_i32 : i32, i32
  }
  func.func @transform_1(%arg0: i32, %arg1: i32) -> (i32, i32) {
    %c0_i32 = arith.constant 0 : i32
    %c0_i32_0 = arith.constant 0 : i32
    return %c0_i32, %arg1 : i32, i32
  }
  func.func @transform_2(%arg0: i32, %arg1: i32) -> (i32, i32) {
    %c0_i32 = arith.constant 0 : i32
    %c0_i32_0 = arith.constant 0 : i32
    return %c0_i32, %arg1 : i32, i32
  }
  func.func @transform_3(%arg0: i32, %arg1: i32) -> (i32, i32) {
    %c0_i32 = arith.constant 0 : i32
    return %arg0, %arg1 : i32, i32
  }
}

module attributes {stable_mosaic.version = 11 : i64} {
  func.func @_conv3x3_kernel(%arg0: i32, %arg1: i32, %arg2: memref<1x10x10x128xbf16, #tpu.memory_space<vmem>>, %arg3: memref<3x3x128x128xbf16, #tpu.memory_space<vmem>>, %arg4: memref<1x128xf32, #tpu.memory_space<vmem>>, %arg5: memref<1x8x8x128xbf16, #tpu.memory_space<vmem>>) attributes {dimension_semantics = [#tpu.dimension_semantics<parallel>, #tpu.dimension_semantics<parallel>], iteration_bounds = array<i64: 2, 1>, scalar_prefetch = 0 : i64, scratch_operands = 0 : i64, tpu.core_type = #tpu.core_type<tc>, window_params = [{transform_indices = @transform_0, window_bounds = array<i64: 1, 10, 10, 128>}, {transform_indices = @transform_1, window_bounds = array<i64: 3, 3, 128, 128>}, {transform_indices = @transform_2, window_bounds = array<i64: 1, 128>}, {transform_indices = @transform_3, window_bounds = array<i64: 1, 8, 8, 128>}]} {
    %cst = arith.constant 0.000000e+00 : f32
    %0 = vector.broadcast %cst : f32 to vector<64x128xf32>
    %c0 = arith.constant 0 : index
    %c0_0 = arith.constant 0 : index
    %c0_1 = arith.constant 0 : index
    %c0_2 = arith.constant 0 : index
    %1 = vector.load %arg2[%c0, %c0_0, %c0_1, %c0_2] : memref<1x10x10x128xbf16, #tpu.memory_space<vmem>>, vector<1x8x8x128xbf16>
    %2 = vector.shape_cast %1 : vector<1x8x8x128xbf16> to vector<8x8x128xbf16>
    %3 = vector.shape_cast %2 : vector<8x8x128xbf16> to vector<64x128xbf16>
    %c0_3 = arith.constant 0 : index
    %c0_4 = arith.constant 0 : index
    %c0_5 = arith.constant 0 : index
    %c0_6 = arith.constant 0 : index
    %4 = vector.load %arg3[%c0_3, %c0_4, %c0_5, %c0_6] : memref<3x3x128x128xbf16, #tpu.memory_space<vmem>>, vector<1x1x128x128xbf16>
    %5 = vector.shape_cast %4 : vector<1x1x128x128xbf16> to vector<128x128xbf16>
    %cst_7 = arith.constant dense<0.000000e+00> : vector<64x128xf32>
    %6 = tpu.matmul %3, %5, %cst_7 {dimension_numbers = #tpu.dot_dimension_numbers<[1], [0], [0], [1], [0, 0, 1, 1], [], []>} : vector<64x128xbf16>, vector<128x128xbf16>, vector<64x128xf32> -> vector<64x128xf32>
    %7 = arith.addf %0, %6 : vector<64x128xf32>
    %c0_8 = arith.constant 0 : index
    %c0_9 = arith.constant 0 : index
    %c1 = arith.constant 1 : index
    %c0_10 = arith.constant 0 : index
    %8 = vector.load %arg2[%c0_8, %c0_9, %c1, %c0_10] : memref<1x10x10x128xbf16, #tpu.memory_space<vmem>>, vector<1x8x8x128xbf16>
    %9 = vector.shape_cast %8 : vector<1x8x8x128xbf16> to vector<8x8x128xbf16>
    %10 = vector.shape_cast %9 : vector<8x8x128xbf16> to vector<64x128xbf16>
    %c0_11 = arith.constant 0 : index
    %c1_12 = arith.constant 1 : index
    %c0_13 = arith.constant 0 : index
    %c0_14 = arith.constant 0 : index
    %11 = vector.load %arg3[%c0_11, %c1_12, %c0_13, %c0_14] : memref<3x3x128x128xbf16, #tpu.memory_space<vmem>>, vector<1x1x128x128xbf16>
    %12 = vector.shape_cast %11 : vector<1x1x128x128xbf16> to vector<128x128xbf16>
    %cst_15 = arith.constant dense<0.000000e+00> : vector<64x128xf32>
    %13 = tpu.matmul %10, %12, %cst_15 {dimension_numbers = #tpu.dot_dimension_numbers<[1], [0], [0], [1], [0, 0, 1, 1], [], []>} : vector<64x128xbf16>, vector<128x128xbf16>, vector<64x128xf32> -> vector<64x128xf32>
    %14 = arith.addf %7, %13 : vector<64x128xf32>
    %c0_16 = arith.constant 0 : index
    %c0_17 = arith.constant 0 : index
    %c2 = arith.constant 2 : index
    %c0_18 = arith.constant 0 : index
    %15 = vector.load %arg2[%c0_16, %c0_17, %c2, %c0_18] : memref<1x10x10x128xbf16, #tpu.memory_space<vmem>>, vector<1x8x8x128xbf16>
    %16 = vector.shape_cast %15 : vector<1x8x8x128xbf16> to vector<8x8x128xbf16>
    %17 = vector.shape_cast %16 : vector<8x8x128xbf16> to vector<64x128xbf16>
    %c0_19 = arith.constant 0 : index
    %c2_20 = arith.constant 2 : index
    %c0_21 = arith.constant 0 : index
    %c0_22 = arith.constant 0 : index
    %18 = vector.load %arg3[%c0_19, %c2_20, %c0_21, %c0_22] : memref<3x3x128x128xbf16, #tpu.memory_space<vmem>>, vector<1x1x128x128xbf16>
    %19 = vector.shape_cast %18 : vector<1x1x128x128xbf16> to vector<128x128xbf16>
    %cst_23 = arith.constant dense<0.000000e+00> : vector<64x128xf32>
    %20 = tpu.matmul %17, %19, %cst_23 {dimension_numbers = #tpu.dot_dimension_numbers<[1], [0], [0], [1], [0, 0, 1, 1], [], []>} : vector<64x128xbf16>, vector<128x128xbf16>, vector<64x128xf32> -> vector<64x128xf32>
    %21 = arith.addf %14, %20 : vector<64x128xf32>
    %c0_24 = arith.constant 0 : index
    %c1_25 = arith.constant 1 : index
    %c0_26 = arith.constant 0 : index
    %c0_27 = arith.constant 0 : index
    %22 = vector.load %arg2[%c0_24, %c1_25, %c0_26, %c0_27] : memref<1x10x10x128xbf16, #tpu.memory_space<vmem>>, vector<1x8x8x128xbf16>
    %23 = vector.shape_cast %22 : vector<1x8x8x128xbf16> to vector<8x8x128xbf16>
    %24 = vector.shape_cast %23 : vector<8x8x128xbf16> to vector<64x128xbf16>
    %c1_28 = arith.constant 1 : index
    %c0_29 = arith.constant 0 : index
    %c0_30 = arith.constant 0 : index
    %c0_31 = arith.constant 0 : index
    %25 = vector.load %arg3[%c1_28, %c0_29, %c0_30, %c0_31] : memref<3x3x128x128xbf16, #tpu.memory_space<vmem>>, vector<1x1x128x128xbf16>
    %26 = vector.shape_cast %25 : vector<1x1x128x128xbf16> to vector<128x128xbf16>
    %cst_32 = arith.constant dense<0.000000e+00> : vector<64x128xf32>
    %27 = tpu.matmul %24, %26, %cst_32 {dimension_numbers = #tpu.dot_dimension_numbers<[1], [0], [0], [1], [0, 0, 1, 1], [], []>} : vector<64x128xbf16>, vector<128x128xbf16>, vector<64x128xf32> -> vector<64x128xf32>
    %28 = arith.addf %21, %27 : vector<64x128xf32>
    %c0_33 = arith.constant 0 : index
    %c1_34 = arith.constant 1 : index
    %c1_35 = arith.constant 1 : index
    %c0_36 = arith.constant 0 : index
    %29 = vector.load %arg2[%c0_33, %c1_34, %c1_35, %c0_36] : memref<1x10x10x128xbf16, #tpu.memory_space<vmem>>, vector<1x8x8x128xbf16>
    %30 = vector.shape_cast %29 : vector<1x8x8x128xbf16> to vector<8x8x128xbf16>
    %31 = vector.shape_cast %30 : vector<8x8x128xbf16> to vector<64x128xbf16>
    %c1_37 = arith.constant 1 : index
    %c1_38 = arith.constant 1 : index
    %c0_39 = arith.constant 0 : index
    %c0_40 = arith.constant 0 : index
    %32 = vector.load %arg3[%c1_37, %c1_38, %c0_39, %c0_40] : memref<3x3x128x128xbf16, #tpu.memory_space<vmem>>, vector<1x1x128x128xbf16>
    %33 = vector.shape_cast %32 : vector<1x1x128x128xbf16> to vector<128x128xbf16>
    %cst_41 = arith.constant dense<0.000000e+00> : vector<64x128xf32>
    %34 = tpu.matmul %31, %33, %cst_41 {dimension_numbers = #tpu.dot_dimension_numbers<[1], [0], [0], [1], [0, 0, 1, 1], [], []>} : vector<64x128xbf16>, vector<128x128xbf16>, vector<64x128xf32> -> vector<64x128xf32>
    %35 = arith.addf %28, %34 : vector<64x128xf32>
    %c0_42 = arith.constant 0 : index
    %c1_43 = arith.constant 1 : index
    %c2_44 = arith.constant 2 : index
    %c0_45 = arith.constant 0 : index
    %36 = vector.load %arg2[%c0_42, %c1_43, %c2_44, %c0_45] : memref<1x10x10x128xbf16, #tpu.memory_space<vmem>>, vector<1x8x8x128xbf16>
    %37 = vector.shape_cast %36 : vector<1x8x8x128xbf16> to vector<8x8x128xbf16>
    %38 = vector.shape_cast %37 : vector<8x8x128xbf16> to vector<64x128xbf16>
    %c1_46 = arith.constant 1 : index
    %c2_47 = arith.constant 2 : index
    %c0_48 = arith.constant 0 : index
    %c0_49 = arith.constant 0 : index
    %39 = vector.load %arg3[%c1_46, %c2_47, %c0_48, %c0_49] : memref<3x3x128x128xbf16, #tpu.memory_space<vmem>>, vector<1x1x128x128xbf16>
    %40 = vector.shape_cast %39 : vector<1x1x128x128xbf16> to vector<128x128xbf16>
    %cst_50 = arith.constant dense<0.000000e+00> : vector<64x128xf32>
    %41 = tpu.matmul %38, %40, %cst_50 {dimension_numbers = #tpu.dot_dimension_numbers<[1], [0], [0], [1], [0, 0, 1, 1], [], []>} : vector<64x128xbf16>, vector<128x128xbf16>, vector<64x128xf32> -> vector<64x128xf32>
    %42 = arith.addf %35, %41 : vector<64x128xf32>
    %c0_51 = arith.constant 0 : index
    %c2_52 = arith.constant 2 : index
    %c0_53 = arith.constant 0 : index
    %c0_54 = arith.constant 0 : index
    %43 = vector.load %arg2[%c0_51, %c2_52, %c0_53, %c0_54] : memref<1x10x10x128xbf16, #tpu.memory_space<vmem>>, vector<1x8x8x128xbf16>
    %44 = vector.shape_cast %43 : vector<1x8x8x128xbf16> to vector<8x8x128xbf16>
    %45 = vector.shape_cast %44 : vector<8x8x128xbf16> to vector<64x128xbf16>
    %c2_55 = arith.constant 2 : index
    %c0_56 = arith.constant 0 : index
    %c0_57 = arith.constant 0 : index
    %c0_58 = arith.constant 0 : index
    %46 = vector.load %arg3[%c2_55, %c0_56, %c0_57, %c0_58] : memref<3x3x128x128xbf16, #tpu.memory_space<vmem>>, vector<1x1x128x128xbf16>
    %47 = vector.shape_cast %46 : vector<1x1x128x128xbf16> to vector<128x128xbf16>
    %cst_59 = arith.constant dense<0.000000e+00> : vector<64x128xf32>
    %48 = tpu.matmul %45, %47, %cst_59 {dimension_numbers = #tpu.dot_dimension_numbers<[1], [0], [0], [1], [0, 0, 1, 1], [], []>} : vector<64x128xbf16>, vector<128x128xbf16>, vector<64x128xf32> -> vector<64x128xf32>
    %49 = arith.addf %42, %48 : vector<64x128xf32>
    %c0_60 = arith.constant 0 : index
    %c2_61 = arith.constant 2 : index
    %c1_62 = arith.constant 1 : index
    %c0_63 = arith.constant 0 : index
    %50 = vector.load %arg2[%c0_60, %c2_61, %c1_62, %c0_63] : memref<1x10x10x128xbf16, #tpu.memory_space<vmem>>, vector<1x8x8x128xbf16>
    %51 = vector.shape_cast %50 : vector<1x8x8x128xbf16> to vector<8x8x128xbf16>
    %52 = vector.shape_cast %51 : vector<8x8x128xbf16> to vector<64x128xbf16>
    %c2_64 = arith.constant 2 : index
    %c1_65 = arith.constant 1 : index
    %c0_66 = arith.constant 0 : index
    %c0_67 = arith.constant 0 : index
    %53 = vector.load %arg3[%c2_64, %c1_65, %c0_66, %c0_67] : memref<3x3x128x128xbf16, #tpu.memory_space<vmem>>, vector<1x1x128x128xbf16>
    %54 = vector.shape_cast %53 : vector<1x1x128x128xbf16> to vector<128x128xbf16>
    %cst_68 = arith.constant dense<0.000000e+00> : vector<64x128xf32>
    %55 = tpu.matmul %52, %54, %cst_68 {dimension_numbers = #tpu.dot_dimension_numbers<[1], [0], [0], [1], [0, 0, 1, 1], [], []>} : vector<64x128xbf16>, vector<128x128xbf16>, vector<64x128xf32> -> vector<64x128xf32>
    %56 = arith.addf %49, %55 : vector<64x128xf32>
    %c0_69 = arith.constant 0 : index
    %c2_70 = arith.constant 2 : index
    %c2_71 = arith.constant 2 : index
    %c0_72 = arith.constant 0 : index
    %57 = vector.load %arg2[%c0_69, %c2_70, %c2_71, %c0_72] : memref<1x10x10x128xbf16, #tpu.memory_space<vmem>>, vector<1x8x8x128xbf16>
    %58 = vector.shape_cast %57 : vector<1x8x8x128xbf16> to vector<8x8x128xbf16>
    %59 = vector.shape_cast %58 : vector<8x8x128xbf16> to vector<64x128xbf16>
    %c2_73 = arith.constant 2 : index
    %c2_74 = arith.constant 2 : index
    %c0_75 = arith.constant 0 : index
    %c0_76 = arith.constant 0 : index
    %60 = vector.load %arg3[%c2_73, %c2_74, %c0_75, %c0_76] : memref<3x3x128x128xbf16, #tpu.memory_space<vmem>>, vector<1x1x128x128xbf16>
    %61 = vector.shape_cast %60 : vector<1x1x128x128xbf16> to vector<128x128xbf16>
    %cst_77 = arith.constant dense<0.000000e+00> : vector<64x128xf32>
    %62 = tpu.matmul %59, %61, %cst_77 {dimension_numbers = #tpu.dot_dimension_numbers<[1], [0], [0], [1], [0, 0, 1, 1], [], []>} : vector<64x128xbf16>, vector<128x128xbf16>, vector<64x128xf32> -> vector<64x128xf32>
    %63 = arith.addf %56, %62 : vector<64x128xf32>
    %c0_78 = arith.constant 0 : index
    %c0_79 = arith.constant 0 : index
    %64 = vector.load %arg4[%c0_78, %c0_79] : memref<1x128xf32, #tpu.memory_space<vmem>>, vector<1x128xf32>
    %65 = vector.shape_cast %64 : vector<1x128xf32> to vector<128xf32>
    %66 = vector.shape_cast %65 : vector<128xf32> to vector<1x128xf32>
    %67 = vector.broadcast %66 : vector<1x128xf32> to vector<64x128xf32>
    %68 = arith.addf %63, %67 : vector<64x128xf32>
    %cst_80 = arith.constant 0.000000e+00 : f32
    %69 = vector.broadcast %cst_80 : f32 to vector<64x128xf32>
    %70 = arith.maximumf %68, %69 : vector<64x128xf32>
    %71 = vector.shape_cast %70 : vector<64x128xf32> to vector<8x8x128xf32>
    %72 = arith.truncf %71 : vector<8x8x128xf32> to vector<8x8x128xbf16>
    %c0_81 = arith.constant 0 : index
    %c0_82 = arith.constant 0 : index
    %c0_83 = arith.constant 0 : index
    %c0_84 = arith.constant 0 : index
    %73 = vector.load %arg5[%c0_81, %c0_82, %c0_83, %c0_84] : memref<1x8x8x128xbf16, #tpu.memory_space<vmem>>, vector<1x8x8x128xbf16>
    %74 = vector.shape_cast %73 : vector<1x8x8x128xbf16> to vector<8x8x128xbf16>
    %75 = vector.shape_cast %72 : vector<8x8x128xbf16> to vector<1x8x8x128xbf16>
    tpu.vector_store %arg5[%c0_81, %c0_82, %c0_83, %c0_84], %75 {strides = array<i32>} : memref<1x8x8x128xbf16, #tpu.memory_space<vmem>>, vector<1x8x8x128xbf16>,
    return
  }
  func.func @transform_0(%arg0: i32, %arg1: i32) -> (i32, i32, i32, i32) {
    %c0_i32 = arith.constant 0 : i32
    %c0_i32_0 = arith.constant 0 : i32
    %c0_i32_1 = arith.constant 0 : i32
    %c0_i32_2 = arith.constant 0 : i32
    return %arg0, %c0_i32, %c0_i32_0, %c0_i32_1 : i32, i32, i32, i32
  }
  func.func @transform_1(%arg0: i32, %arg1: i32) -> (i32, i32, i32, i32) {
    %c0_i32 = arith.constant 0 : i32
    %c0_i32_0 = arith.constant 0 : i32
    %c0_i32_1 = arith.constant 0 : i32
    %c0_i32_2 = arith.constant 0 : i32
    return %c0_i32, %c0_i32_0, %c0_i32_1, %arg1 : i32, i32, i32, i32
  }
  func.func @transform_2(%arg0: i32, %arg1: i32) -> (i32, i32) {
    %c0_i32 = arith.constant 0 : i32
    %c0_i32_0 = arith.constant 0 : i32
    return %c0_i32, %arg1 : i32, i32
  }
  func.func @transform_3(%arg0: i32, %arg1: i32) -> (i32, i32, i32, i32) {
    %c0_i32 = arith.constant 0 : i32
    %c0_i32_0 = arith.constant 0 : i32
    %c0_i32_1 = arith.constant 0 : i32
    return %arg0, %c0_i32, %c0_i32_0, %arg1 : i32, i32, i32, i32
  }
}

module attributes {stable_mosaic.version = 11 : i64} {
  func.func @_gemm_kernel(%arg0: i32, %arg1: i32, %arg2: memref<128x128xbf16, #tpu.memory_space<vmem>>, %arg3: memref<128x128xbf16, #tpu.memory_space<vmem>>, %arg4: memref<128x16xbf16, #tpu.memory_space<vmem>>, %arg5: memref<16x128xbf16, #tpu.memory_space<vmem>>, %arg6: memref<1x128xf32, #tpu.memory_space<vmem>>, %arg7: memref<128x128xf32, #tpu.memory_space<vmem>>) attributes {dimension_semantics = [#tpu.dimension_semantics<parallel>, #tpu.dimension_semantics<parallel>], iteration_bounds = array<i64: 1, 1>, scalar_prefetch = 0 : i64, scratch_operands = 0 : i64, tpu.core_type = #tpu.core_type<tc>, window_params = [{transform_indices = @transform_0, window_bounds = array<i64: 128, 128>}, {transform_indices = @transform_1, window_bounds = array<i64: 128, 128>}, {transform_indices = @transform_2, window_bounds = array<i64: 128, 16>}, {transform_indices = @transform_3, window_bounds = array<i64: 16, 128>}, {transform_indices = @transform_4, window_bounds = array<i64: 1, 128>}, {transform_indices = @transform_5, window_bounds = array<i64: 128, 128>}]} {
    %cst = arith.constant 0.000000e+00 : f32
    %0 = vector.broadcast %cst : f32 to vector<128x128xf32>
    %c0 = arith.constant 0 : index
    %c0_0 = arith.constant 0 : index
    %1 = vector.load %arg2[%c0, %c0_0] : memref<128x128xbf16, #tpu.memory_space<vmem>>, vector<128x128xbf16>
    %c0_1 = arith.constant 0 : index
    %c0_2 = arith.constant 0 : index
    %2 = vector.load %arg3[%c0_1, %c0_2] : memref<128x128xbf16, #tpu.memory_space<vmem>>, vector<128x128xbf16>
    %cst_3 = arith.constant dense<0.000000e+00> : vector<128x128xf32>
    %3 = tpu.matmul %1, %2, %cst_3 {dimension_numbers = #tpu.dot_dimension_numbers<[1], [0], [0], [1], [0, 0, 1, 1], [], []>} : vector<128x128xbf16>, vector<128x128xbf16>, vector<128x128xf32> -> vector<128x128xf32>
    %4 = arith.addf %0, %3 : vector<128x128xf32>
    %c0_4 = arith.constant 0 : index
    %c0_5 = arith.constant 0 : index
    %5 = vector.load %arg4[%c0_4, %c0_5] : memref<128x16xbf16, #tpu.memory_space<vmem>>, vector<128x16xbf16>
    %c0_6 = arith.constant 0 : index
    %c0_7 = arith.constant 0 : index
    %6 = vector.load %arg5[%c0_6, %c0_7] : memref<16x128xbf16, #tpu.memory_space<vmem>>, vector<16x128xbf16>
    %cst_8 = arith.constant dense<0.000000e+00> : vector<128x128xf32>
    %7 = tpu.matmul %5, %6, %cst_8 {dimension_numbers = #tpu.dot_dimension_numbers<[1], [0], [0], [1], [0, 0, 1, 1], [], []>} : vector<128x16xbf16>, vector<16x128xbf16>, vector<128x128xf32> -> vector<128x128xf32>
    %8 = arith.addf %4, %7 : vector<128x128xf32>
    %c0_9 = arith.constant 0 : index
    %c0_10 = arith.constant 0 : index
    %9 = vector.load %arg6[%c0_9, %c0_10] : memref<1x128xf32, #tpu.memory_space<vmem>>, vector<1x128xf32>
    %10 = vector.broadcast %9 : vector<1x128xf32> to vector<128x128xf32>
    %11 = arith.addf %8, %10 : vector<128x128xf32>
    %cst_11 = arith.constant 0.000000e+00 : f32
    %12 = vector.broadcast %cst_11 : f32 to vector<128x128xf32>
    %13 = arith.maximumf %11, %12 : vector<128x128xf32>
    %c0_12 = arith.constant 0 : index
    %c0_13 = arith.constant 0 : index
    %14 = vector.load %arg7[%c0_12, %c0_13] : memref<128x128xf32, #tpu.memory_space<vmem>>, vector<128x128xf32>
    tpu.vector_store %arg7[%c0_12, %c0_13], %13 {strides = array<i32>} : memref<128x128xf32, #tpu.memory_space<vmem>>, vector<128x128xf32>,
    return
  }
  func.func @transform_0(%arg0: i32, %arg1: i32) -> (i32, i32) {
    %c0_i32 = arith.constant 0 : i32
    %c0_i32_0 = arith.constant 0 : i32
    return %arg0, %c0_i32 : i32, i32
  }
  func.func @transform_1(%arg0: i32, %arg1: i32) -> (i32, i32) {
    %c0_i32 = arith.constant 0 : i32
    %c0_i32_0 = arith.constant 0 : i32
    return %c0_i32, %arg1 : i32, i32
  }
  func.func @transform_2(%arg0: i32, %arg1: i32) -> (i32, i32) {
    %c0_i32 = arith.constant 0 : i32
    %c0_i32_0 = arith.constant 0 : i32
    return %arg0, %c0_i32 : i32, i32
  }
  func.func @transform_3(%arg0: i32, %arg1: i32) -> (i32, i32) {
    %c0_i32 = arith.constant 0 : i32
    %c0_i32_0 = arith.constant 0 : i32
    return %c0_i32, %arg1 : i32, i32
  }
  func.func @transform_4(%arg0: i32, %arg1: i32) -> (i32, i32) {
    %c0_i32 = arith.constant 0 : i32
    %c0_i32_0 = arith.constant 0 : i32
    return %c0_i32, %arg1 : i32, i32
  }
  func.func @transform_5(%arg0: i32, %arg1: i32) -> (i32, i32) {
    %c0_i32 = arith.constant 0 : i32
    return %arg0, %arg1 : i32, i32
  }
}

</mosaic_0001>

<bundles_post_ra>
// kernel: resnet_enc_block_forward.3
= control target key start
LH: loop header
LB: loop body
LE: loop exit
PB: predicated region body
PF: predicated region fallthrough
CT: control target
= control target key end

     0   :  { %vm86_vm0 = vcmask 130048   ;;  %s525_s1 = inlined_call_operand.vmem [shape: bf16[16,128], index: 1, kind: input, shape index: {}]   ;;  %s526_s0 = inlined_call_operand.vmem [shape: bf16[128,16], index: 0, kind: input, shape index: {}]   ;;  %s527_s2 = inlined_call_operand.vmem [shape: f32[1,128], index: 2, kind: input, shape index: {}]   ;;  %s528_s3 = inlined_call_operand.vmem [shape: bf16[128,128], index: 3, kind: output, shape index: {}]  }
   0x1   :  { %v434_v0 = vld [vmem:[%s525_s1] sm:$0xff]   ;;  %v437_v3 = vld [vmem:[%s526_s0 + $0x8] sm:$0xff]   ;;  %v439_v5 = vld [vmem:[%s526_s0 + $0x10] sm:$0xff]  }
   0x2   :  { %v435_v1 = vld [vmem:[%s526_s0] sm:$0xff]   ;;  %414 = vmatprep.subr.bf16.mxu0 %v434_v0  ;;  %432 = vmatprep.subr.bf16.mxu1 %v434_v0  ;;  %v438_v4 = vld [vmem:[%s526_s0 + $0x28] sm:$0xff]   ;;  %v440_v6 = vld [vmem:[%s526_s0 + $0x30] sm:$0xff]  }
   0x3   :  { %v436_v2 = vld [vmem:[%s526_s0 + $0x20] sm:$0xff]   ;;  %415 = vmatpush3.bf16.msra.mxu0 %v434_v0  ;;  %433 = vmatpush3.bf16.msra.mxu1 %v434_v0  ;;  %v441_v7 = vld [vmem:[%s526_s0 + $0x18] sm:$0xff]  }
   0x4   :  { %416 = vmatprep.mubr.msk.bf16.mxu0 %vm86_vm0, %v435_v1  ;;  %424 = vmatprep.mubr.msk.bf16.mxu1 %vm86_vm0, %v436_v2  ;;  %v442_v8 = vld [vmem:[%s526_s0 + $0x38] sm:$0xff]   ;;  %v308_v9 = vld [vmem:[%s527_s2] ss:$0 sm:$0xff] }
   0x6   :  { %417 = vmatmul.mubr.msk.bf16.vlgmr.msra.gmra.mrb[0].mxu0 %vm86_vm0, %v437_v3  ;;  %425 = vmatmul.mubr.msk.bf16.vlgmr.msra.gmra.mrb[0].mxu1 %vm86_vm0, %v438_v4 }
   0x7   :  { %420 = vmatprep.mubr.msk.bf16.mxu0 %vm86_vm0, %v439_v5  ;;  %428 = vmatprep.mubr.msk.bf16.mxu1 %vm86_vm0, %v440_v6 }
   0xe   :  { %421 = vmatmul.mubr.msk.bf16.gmra.mrb[4].mxu0 %vm86_vm0, %v441_v7  ;;  %429 = vmatmul.mubr.msk.bf16.gmra.mrb[4].mxu1 %vm86_vm0, %v442_v8 }
  0xd9   :  { %v418_v10 = vpop.f32.mrb[0].mxu0  ;;  %v426_v11 = vpop.f32.mrb[0].mxu1 }
  0xda   :  { %v154_v12 = vadd.f32 %v418_v10, %v308_v9  ;;  %v186_v13 = vadd.f32 %v426_v11, %v308_v9  ;;  %v145_v14 = vpop.f32.mrb[1].mxu0  ;;  %v177_v15 = vpop.f32.mrb[1].mxu1 }
  0xdb   :  { %v146_v16 = vadd.f32 %v308_v9, %v145_v14  ;;  %v178_v17 = vadd.f32 %v308_v9, %v177_v15  ;;  %v419_v18 = vpop.f32.mrb[2].mxu0  ;;  %v427_v19 = vpop.f32.mrb[2].mxu1 }
  0xdc   :  { %v157_v20 = vadd.f32 %v419_v18, %v308_v9  ;;  %v189_v21 = vadd.f32 %v427_v19, %v308_v9  ;;  %v148_v22 = vpop.f32.mrb[3].mxu0  ;;  %v180_v23 = vpop.f32.mrb[3].mxu1  ;;  %v210_v26 = vmax.f32 %v154_v12, 0.0  ;;  %v218_v27 = vmax.f32 %v186_v13, 0.0 }
  0xdd   :  { %v149_v24 = vadd.f32 %v308_v9, %v148_v22  ;;  %v181_v25 = vadd.f32 %v308_v9, %v180_v23  ;;  %v208_v30 = vmax.f32 %v146_v16, 0.0  ;;  %v216_v31 = vmax.f32 %v178_v17, 0.0 }
  0xde   :  { %v211_v28 = vmax.f32 %v157_v20, 0.0  ;;  %v219_v29 = vmax.f32 %v189_v21, 0.0 }
  0xdf   :  { %v209_v32 = vmax.f32 %v149_v24, 0.0  ;;  %v217_v33 = vmax.f32 %v181_v25, 0.0 }
  0xe0   :  { %v366_v34 = vpack.c.bf16 %v211_v28, %v210_v26  ;;  %v386_v35 = vpack.c.bf16 %v219_v29, %v218_v27 }
  0xe1   :  { %v361_v36 = vpack.c.bf16 %v209_v32, %v208_v30  ;;  %v381_v37 = vpack.c.bf16 %v217_v33, %v216_v31  ;;  %v422_v38 = vpop.f32.mrb[4].mxu0  ;;  %v430_v39 = vpop.f32.mrb[4].mxu1 }
  0xe2   :  { %398 = vst [vmem:[%s528_s3 + $0x8] sm:$0xff] %v366_v34   ;;  %402 = vst [vmem:[%s528_s3 + $0x28] sm:$0xff] %v386_v35   ;;  %v170_v40 = vadd.f32 %v422_v38, %v308_v9  ;;  %v202_v41 = vadd.f32 %v430_v39, %v308_v9  ;;  %v161_v42 = vpop.f32.mrb[5].mxu0  ;;  %v193_v43 = vpop.f32.mrb[5].mxu1 }
  0xe3   :  { %362 = vst [vmem:[%s528_s3] sm:$0xff] %v361_v36   ;;  %401 = vst [vmem:[%s528_s3 + $0x20] sm:$0xff] %v381_v37   ;;  %v162_v44 = vadd.f32 %v308_v9, %v161_v42  ;;  %v194_v45 = vadd.f32 %v308_v9, %v193_v43  ;;  %v423_v46 = vpop.f32.mrb[6].mxu0  ;;  %v431_v47 = vpop.f32.mrb[6].mxu1 }
  0xe4   :  { %v173_v48 = vadd.f32 %v423_v46, %v308_v9  ;;  %v205_v49 = vadd.f32 %v431_v47, %v308_v9  ;;  %v164_v50 = vpop.f32.mrb[7].mxu0  ;;  %v196_v51 = vpop.f32.mrb[7].mxu1  ;;  %v214_v54 = vmax.f32 %v170_v40, 0.0  ;;  %v222_v55 = vmax.f32 %v202_v41, 0.0 }
  0xe5   :  { %v165_v52 = vadd.f32 %v308_v9, %v164_v50  ;;  %v197_v53 = vadd.f32 %v308_v9, %v196_v51  ;;  %v212_v58 = vmax.f32 %v162_v44, 0.0  ;;  %v220_v59 = vmax.f32 %v194_v45, 0.0 }
  0xe6   :  { %v215_v56 = vmax.f32 %v173_v48, 0.0  ;;  %v223_v57 = vmax.f32 %v205_v49, 0.0 }
  0xe7   :  { %v213_v60 = vmax.f32 %v165_v52, 0.0  ;;  %v221_v61 = vmax.f32 %v197_v53, 0.0 }
  0xe8   :  { %v376_v62 = vpack.c.bf16 %v215_v56, %v214_v54  ;;  %v396_v63 = vpack.c.bf16 %v223_v57, %v222_v55 }
  0xe9   :  { %v371_v0 = vpack.c.bf16 %v213_v60, %v212_v58  ;;  %v391_v1 = vpack.c.bf16 %v221_v61, %v220_v59 }
  0xea   :  { %400 = vst [vmem:[%s528_s3 + $0x18] sm:$0xff] %v376_v62   ;;  %404 = vst [vmem:[%s528_s3 + $0x38] sm:$0xff] %v396_v63  }
  0xeb   :  { %399 = vst [vmem:[%s528_s3 + $0x10] sm:$0xff] %v371_v0   ;;  %403 = vst [vmem:[%s528_s3 + $0x30] sm:$0xff] %v391_v1  }

// kernel: resnet_enc_block_forward.5
= control target key start
LH: loop header
LB: loop body
LE: loop exit
PB: predicated region body
PF: predicated region fallthrough
CT: control target
= control target key end

     0   :  { %vm118_vm0 = vcmask 130048   ;;  %s846_s0 = inlined_call_operand.vmem [shape: bf16[128,128], index: 0, kind: input, shape index: {}]   ;;  %s847_s1 = inlined_call_operand.vmem [shape: bf16[128,128], index: 1, kind: input, shape index: {}]   ;;  %s848_s2 = inlined_call_operand.vmem [shape: bf16[128,16], index: 2, kind: input, shape index: {}]   ;;  %s849_s3 = inlined_call_operand.vmem [shape: bf16[16,128], index: 3, kind: input, shape index: {}]   ;;  %s850_s4 = inlined_call_operand.vmem [shape: f32[1,128], index: 4, kind: input, shape index: {}]   ;;  %s851_s5 = inlined_call_operand.hbm [shape: f32[128,128], index: 5, kind: output, shape index: {}]  }
   0x1   :  { %v648_v0 = vld [vmem:[%s849_s3] sm:$0xff]   ;;  %v651_v3 = vld [vmem:[%s848_s2 + $0x8] sm:$0xff]   ;;  %v653_v5 = vld [vmem:[%s847_s1 + $0x10] sm:$0xff]  }
   0x2   :  { %v649_v1 = vld [vmem:[%s847_s1] sm:$0xff]   ;;  %563 = vmatprep.subr.bf16.mxu0 %v648_v0  ;;  %v652_v4 = vld [vmem:[%s847_s1 + $0x8] sm:$0xff]   ;;  %v654_v6 = vld [vmem:[%s848_s2 + $0x10] sm:$0xff]  }
   0x3   :  { %v650_v2 = vld [vmem:[%s848_s2] sm:$0xff]   ;;  %613 = vmatprep.subr.bf16.mxu1 %v649_v1  ;;  %564 = vmatpush3.bf16.msra.mxu0 %v648_v0  ;;  %v656_v7 = vld [vmem:[%s847_s1 + $0x18] sm:$0xff]   ;;  %v660_v11 = vld [vmem:[%s847_s1 + $0x28] sm:$0xff]  }
   0x4   :  { %621 = vmatpush3.bf16.msra.mxu1 %v649_v1  ;;  %565 = vmatprep.mubr.msk.bf16.mxu0 %vm118_vm0, %v650_v2  ;;  %v655_v8 = vld [vmem:[%s848_s2 + $0x18] sm:$0xff]   ;;  %v658_v9 = vld [vmem:[%s848_s2 + $0x20] sm:$0xff]   ;;  %v659_v13 = vld [vmem:[%s848_s2 + $0x28] sm:$0xff]  }
   0x5   :  { %581 = vmatprep.subr.bf16.mxu0 %v649_v1  ;;  %614 = vmatprep.subr.bf16.mxu1 %v652_v4  ;;  %v657_v10 = vld [vmem:[%s847_s1 + $0x20] sm:$0xff]   ;;  %v662_v14 = vld [vmem:[%s848_s2 + $0x30] sm:$0xff]   ;;  %v664_v16 = vld [vmem:[%s847_s1 + $0x38] sm:$0xff]  }
   0x6   :  { %566 = vmatmul.mubr.msk.bf16.vlgmr.msra.gmra.mrb[0].mxu0 %vm118_vm0, %v651_v3  ;;  %v665_v12 = vld [vmem:[%s846_s0 + $0x20] sm:$0xff]   ;;  %v661_v15 = vld [vmem:[%s847_s1 + $0x30] sm:$0xff]  }
   0x7   :  { %582 = vmatpush3.bf16.msra.mxu0 %v649_v1  ;;  %569 = vmatprep.mubr.msk.bf16.mxu0 %vm118_vm0, %v654_v6 }
   0x8   :  { %622 = vmatpush3.bf16.msra.mxu1 %v652_v4  ;;  %583 = vmatprep.subr.bf16.mxu0 %v652_v4 }
   0x9   :  { %615 = vmatprep.subr.bf16.mxu1 %v653_v5  ;;  %605 = vmatprep.mubr.bf16.mxu1 %v665_v12 }
   0xb   :  { %584 = vmatpush3.bf16.msra.mxu0 %v652_v4 }
   0xc   :  { %623 = vmatpush3.bf16.msra.mxu1 %v653_v5  ;;  %585 = vmatprep.subr.bf16.mxu0 %v653_v5 }
   0xd   :  { %616 = vmatprep.subr.bf16.mxu1 %v656_v7 }
   0xe   :  { %570 = vmatmul.mubr.msk.bf16.gmra.mrb[4].mxu0 %vm118_vm0, %v655_v8 }
   0xf   :  { %586 = vmatpush3.bf16.msra.mxu0 %v653_v5  ;;  %573 = vmatprep.mubr.msk.bf16.mxu0 %vm118_vm0, %v658_v9 }
  0x10   :  { %624 = vmatpush3.bf16.msra.mxu1 %v656_v7  ;;  %587 = vmatprep.subr.bf16.mxu0 %v656_v7 }
  0x11   :  { %617 = vmatprep.subr.bf16.mxu1 %v657_v10 }
  0x13   :  { %588 = vmatpush3.bf16.msra.mxu0 %v656_v7 }
  0x14   :  { %625 = vmatpush3.bf16.msra.mxu1 %v657_v10  ;;  %589 = vmatprep.subr.bf16.mxu0 %v657_v10 }
  0x15   :  { %618 = vmatprep.subr.bf16.mxu1 %v660_v11 }
  0x16   :  { %574 = vmatmul.mubr.msk.bf16.gmra.mrb[8].mxu0 %vm118_vm0, %v659_v13 }
  0x17   :  { %590 = vmatpush3.bf16.msra.mxu0 %v657_v10  ;;  %577 = vmatprep.mubr.msk.bf16.mxu0 %vm118_vm0, %v662_v14 }
  0x18   :  { %626 = vmatpush3.bf16.msra.mxu1 %v660_v11  ;;  %591 = vmatprep.subr.bf16.mxu0 %v660_v11 }
  0x19   :  { %619 = vmatprep.subr.bf16.mxu1 %v661_v15 }
  0x1a   :  { %10 = vsyncpa [#allocation3], 0  ;;  %v663_v17 = vld [vmem:[%s848_s2 + $0x38] sm:$0xff]   ;;  %v667_v18 = vld [vmem:[%s846_s0] sm:$0xff]  }
  0x1b   :  { %592 = vmatpush3.bf16.msra.mxu0 %v660_v11  ;;  %v666_v19 = vld [vmem:[%s846_s0 + $0x28] sm:$0xff]   ;;  %v669_v20 = vld [vmem:[%s846_s0 + $0x30] sm:$0xff]   ;;  %v670_v23 = vld [vmem:[%s846_s0 + $0x38] sm:$0xff]  }
  0x1c   :  { %627 = vmatpush3.bf16.msra.mxu1 %v661_v15  ;;  %593 = vmatprep.subr.bf16.mxu0 %v661_v15  ;;  %v668_v21 = vld [vmem:[%s846_s0 + $0x8] sm:$0xff]   ;;  %v671_v22 = vld [vmem:[%s846_s0 + $0x10] sm:$0xff]   ;;  %v672_v24 = vld [vmem:[%s846_s0 + $0x18] sm:$0xff]   ;;  %s697_s0 = smov [#allocation2]  }
  0x1d   :  { %620 = vmatprep.subr.bf16.mxu1 %v664_v16  ;;  %v816_v34 = vld [vmem:[%s850_s4] ss:$0 sm:$0xff]  ;;  %s493_s4 = sshll.u32 %s697_s0, 4  ;;  %s494_s4 = int_to_ptr.vmem [resolvable:$true] %s493_s4 }
  0x1e   :  { %578 = vmatmul.mubr.msk.bf16.gmra.mrb[12].mxu0 %vm118_vm0, %v663_v17  ;;  %s673_s16 = scalar_lea.vmem %s494_s4, 2048  ;;  %p678_p1 = scmp.lt.s32.totalorder %s494_s4, %s494_s4 }
  0x1f   :  { %594 = vmatpush3.bf16.msra.mxu0 %v661_v15  ;;  %597 = vmatprep.mubr.bf16.mxu0 %v667_v18  ;;  %p674_p0 = scmp.ne.s32.totalorder %s494_s4, %s673_s16  ;;  %p679_p2 = scmp.lt.s32.totalorder %s673_s16, %s673_s16 }
  0x20   :  { %628 = vmatpush3.bf16.msra.mxu1 %v664_v16  ;;  %595 = vmatprep.subr.bf16.mxu0 %v664_v16 }
  0x21   :  { %p680_p3 = por %p679_p2, %p678_p1 }
  0x23   :  { %606 = vmatmul.mubr.bf16.vlgmr.msra.gmra.mrb[0].mxu1 %v666_v19  ;;  %596 = vmatpush3.bf16.msra.mxu0 %v664_v16  ;;  %p681_p4 = pnand %p680_p3, %p674_p0 }
  0x24   :  { %609 = vmatprep.mubr.bf16.mxu1 %v669_v20 }
  0x26   :  { %598 = vmatmul.mubr.bf16.vlgmr.msra.gmra.mrb[0].mxu0 %v668_v21 }
  0x27   :  { %601 = vmatprep.mubr.bf16.mxu0 %v671_v22 }
  0x2b   :  { %610 = vmatmul.mubr.bf16.gmra.mrb[4].mxu1 %v670_v23 }
  0x2e   :  { %602 = vmatmul.mubr.bf16.gmra.mrb[4].mxu0 %v672_v24 }
  0xe9   :  { %v575_v25 = vpop.f32.mrb[8].mxu0 }
  0xea   :  { %v209_v26 = vpop.f32.mrb[9].mxu0 }
  0xeb   :  { %v576_v27 = vpop.f32.mrb[10].mxu0 }
  0xec   :  { %v212_v28 = vpop.f32.mrb[11].mxu0 }
  0xf1   :  { %v579_v29 = vpop.f32.mrb[12].mxu0 }
  0xf2   :  { %v225_v30 = vpop.f32.mrb[13].mxu0 }
  0xf3   :  { %v580_v31 = vpop.f32.mrb[14].mxu0 }
  0xf4   :  { %v228_v32 = vpop.f32.mrb[15].mxu0 }
  0xf6   :  { %v607_v33 = vpop.f32.mrb[0].mxu1 }
  0xf7   :  { %v411_v35 = vadd.f32 %v607_v33, %v575_v25  ;;  %v402_v36 = vpop.f32.mrb[1].mxu1 }
  0xf8   :  { %v403_v37 = vadd.f32 %v402_v36, %v209_v26  ;;  %v608_v38 = vpop.f32.mrb[2].mxu1 }
  0xf9   :  { %v450_v39 = vadd.f32 %v816_v34, %v411_v35  ;;  %v414_v40 = vadd.f32 %v608_v38, %v576_v27  ;;  %v405_v41 = vpop.f32.mrb[3].mxu1  ;;  %v599_v42 = vpop.f32.mrb[0].mxu0 }
  0xfa   :  { %v448_v43 = vadd.f32 %v816_v34, %v403_v37  ;;  %v406_v44 = vadd.f32 %v405_v41, %v212_v28  ;;  %v442_v45 = vadd.f32 %v599_v42, %v816_v34  ;;  %v370_v46 = vpop.f32.mrb[1].mxu0 }
  0xfb   :  { %v466_v47 = vmax.f32 %v450_v39, 0.0  ;;  %v451_v48 = vadd.f32 %v816_v34, %v414_v40  ;;  %v440_v49 = vadd.f32 %v816_v34, %v370_v46  ;;  %v600_v50 = vpop.f32.mrb[2].mxu0 }
  0xfc   :  { %v464_v51 = vmax.f32 %v448_v43, 0.0  ;;  %v449_v52 = vadd.f32 %v816_v34, %v406_v44  ;;  %v458_v53 = vmax.f32 %v442_v45, 0.0  ;;  %v443_v54 = vadd.f32 %v600_v50, %v816_v34  ;;  %v373_v55 = vpop.f32.mrb[3].mxu0 }
  0xfd   :  { %482 = vst [vmem:[#allocation2 + $0x50] sm:$0xff] %v466_v47  ;;  %v467_v56 = vmax.f32 %v451_v48, 0.0  ;;  %v456_v57 = vmax.f32 %v440_v49, 0.0  ;;  %v441_v58 = vadd.f32 %v816_v34, %v373_v55 }
  0xfe   :  { %480 = vst [vmem:[#allocation2 + $0x40] sm:$0xff] %v464_v51  ;;  %v465_v59 = vmax.f32 %v449_v52, 0.0  ;;  %474 = vst [vmem:[#allocation2 + $0x10] sm:$0xff] %v458_v53  ;;  %v459_v60 = vmax.f32 %v443_v54, 0.0  ;;  %v611_v61 = vpop.f32.mrb[4].mxu1 }
  0xff   :  { %483 = vst [vmem:[#allocation2 + $0x58] sm:$0xff] %v467_v56  ;;  %472 = vst [vmem:[#allocation2] sm:$0xff] %v456_v57  ;;  %v457_v62 = vmax.f32 %v441_v58, 0.0  ;;  %v427_v63 = vadd.f32 %v611_v61, %v579_v29  ;;  %v418_v0 = vpop.f32.mrb[5].mxu1 }
 0x100   :  { %481 = vst [vmem:[#allocation2 + $0x48] sm:$0xff] %v465_v59  ;;  %475 = vst [vmem:[#allocation2 + $0x18] sm:$0xff] %v459_v60  ;;  %v419_v1 = vadd.f32 %v418_v0, %v225_v30  ;;  %v612_v2 = vpop.f32.mrb[6].mxu1 }
 0x101   :  { %473 = vst [vmem:[#allocation2 + $0x8] sm:$0xff] %v457_v62  ;;  %v454_v3 = vadd.f32 %v816_v34, %v427_v63  ;;  %v430_v4 = vadd.f32 %v612_v2, %v580_v31  ;;  %v421_v5 = vpop.f32.mrb[7].mxu1  ;;  %v603_v6 = vpop.f32.mrb[4].mxu0 }
 0x102   :  { %v452_v7 = vadd.f32 %v816_v34, %v419_v1  ;;  %v422_v8 = vadd.f32 %v421_v5, %v228_v32  ;;  %v446_v9 = vadd.f32 %v603_v6, %v816_v34  ;;  %v386_v10 = vpop.f32.mrb[5].mxu0 }
 0x103   :  { %v470_v11 = vmax.f32 %v454_v3, 0.0  ;;  %v455_v12 = vadd.f32 %v816_v34, %v430_v4  ;;  %v444_v13 = vadd.f32 %v816_v34, %v386_v10  ;;  %v604_v14 = vpop.f32.mrb[6].mxu0 }
 0x104   :  { %v468_v15 = vmax.f32 %v452_v7, 0.0  ;;  %v453_v16 = vadd.f32 %v816_v34, %v422_v8  ;;  %v462_v17 = vmax.f32 %v446_v9, 0.0  ;;  %v447_v18 = vadd.f32 %v604_v14, %v816_v34  ;;  %v389_v19 = vpop.f32.mrb[7].mxu0 }
 0x105   :  { %486 = vst [vmem:[#allocation2 + $0x70] sm:$0xff] %v470_v11  ;;  %v471_v20 = vmax.f32 %v455_v12, 0.0  ;;  %v460_v21 = vmax.f32 %v444_v13, 0.0  ;;  %v445_v22 = vadd.f32 %v816_v34, %v389_v19 }
 0x106   :  { %484 = vst [vmem:[#allocation2 + $0x60] sm:$0xff] %v468_v15  ;;  %v469_v23 = vmax.f32 %v453_v16, 0.0  ;;  %478 = vst [vmem:[#allocation2 + $0x30] sm:$0xff] %v462_v17  ;;  %v463_v24 = vmax.f32 %v447_v18, 0.0 }
 0x107   :  { %487 = vst [vmem:[#allocation2 + $0x78] sm:$0xff] %v471_v20  ;;  %476 = vst [vmem:[#allocation2 + $0x20] sm:$0xff] %v460_v21  ;;  %v461_v25 = vmax.f32 %v445_v22, 0.0 }
 0x108   :  { %485 = vst [vmem:[#allocation2 + $0x68] sm:$0xff] %v469_v23  ;;  %479 = vst [vmem:[#allocation2 + $0x38] sm:$0xff] %v463_v24 }
 0x109   :  { %477 = vst [vmem:[#allocation2 + $0x28] sm:$0xff] %v461_v25 }
 0x10a   :  { %684 = shalt.err (!%p681_p4)
}
 0x10b   :  { %s685_s19 = scalar_lea.hbm %s851_s5, 2048 }
 0x10c   :  { %p686_p5 = scmp.ne.s32.totalorder %s851_s5, %s685_s19  ;;  %p689_p6 = scmp.lt.u32.totalorder %s685_s19, %s851_s5 }
 0x10e   :  { %p691_p7 = pnand %p689_p6, %p686_p5 }
 0x110   :  { %694 = shalt.err (!%p691_p7)
}
 0x111   :  { %s698_s24 = smov 128   ;;  %s699_s25 = smov 8  }
 0x112   :  { %499 = dma.vmem_to_hbm [thread:$0]  %s494_s4, 2048, %s851_s5, [#allocation3], %s698_s24, %s698_s24, %s699_s25  }
 0x113   :  { %695 = dma.done.wait [#allocation3], 2048  }
 0x114   :  { %696 = vsyncadd [#allocation3], 4294965248 }
 0x115   :  { %503 = vsyncpa [#allocation3], 1 }

// kernel: resnet_enc_block_forward.4
= control target key start
LH: loop header
LB: loop body
LE: loop exit
PB: predicated region body
PF: predicated region fallthrough
CT: control target
= control target key end

     0   :  { %s3254_s12 = smov 0   ;;  %s3256_s13 = smov 0   ;;  %s3842_s0 = inlined_call_operand.vmem [shape: bf16[2,10,10,128], index: 0, kind: input, shape index: {}]   ;;  %s3843_s1 = inlined_call_operand.vmem [shape: bf16[3,3,128,128], index: 1, kind: input, shape index: {}]   ;;  %s3844_s2 = inlined_call_operand.vmem [shape: f32[1,128], index: 2, kind: input, shape index: {}]   ;;  %s3845_s3 = inlined_call_operand.vmem [shape: bf16[2,8,8,128], index: 3, kind: output, shape index: {}]  }
   0x1   :  { %s3258_s14 = smov 0  }
   0x2 LB: > { %s25_s15 = sadd.s32 1, %s3228_s13  ;;  %p2342_p0 = scmp.ge.s32.totalorder %s3232_s14, 1  ;;  %s3232_s14 = sphi %s3258_s14, %s13_s14   ;;  %s3228_s13 = sphi %s3256_s13, %s3851_s13   ;;  %s3224_s12 = sphi %s3254_s12, %s3850_s12  }
   0x3   : > { %p27_p1 = scmp.ge.s32.totalorder %s25_s15, 2  ;;  %p168_p2 = scmp.lt.s32.totalorder %s3232_s14, 3 }
   0x5   : > { %s3853_s15 = smov (%p27_p1, %s25_s15), 0  ;;  %p169_p3 = pnand %p2342_p0, %p168_p2 }
   0x6   : > { %v3126_v0 = vld [vmem:[%s3843_s1 + $0x40] sm:$0xff] (!%p169_p3)   ;;  %p202_p4 = scmp.lt.s32.totalorder (!%p169_p3), %s3224_s12, 1  ;;  %v3128_v2 = vld [vmem:[%s3843_s1 + $0x48] sm:$0xff] (!%p169_p3)   ;;  %v3130_v4 = vld [vmem:[%s3843_s1 + $0x50] sm:$0xff] (!%p169_p3)   ;;  %vm255_vm0 = vsmask.f32 (!%p169_p3), 3328 }
   0x7   : > { %172 = sbr.rel (%p169_p3) target bundleno = 397 (0x18d), region = 32  ;;  %v3127_v1 = vld [vmem:[%s3843_s1 + $0x100] sm:$0xff] (!%p169_p3)   ;;  %2805 = vmatprep.subr.bf16.mxu1 (!%p169_p3), %v3126_v0  ;;  %v3129_v3 = vld [vmem:[%s3843_s1 + $0x108] sm:$0xff] (!%p169_p3)   ;;  %v3131_v5 = vld [vmem:[%s3843_s1 + $0x110] sm:$0xff] (!%p169_p3)   ;;  %vm256_vm1 = vsmask.f32 (!%p169_p3), 7440 }
   0x8   : > { %2901 = vmatprep.subr.bf16.mxu0 (!%p169_p3), %v3127_v1  ;;  %2806 = vmatpush3.bf16.msra.mxu1 (!%p169_p3), %v3126_v0  ;;  %v3132_v6 = vld [vmem:[%s3843_s1 + $0x58] sm:$0xff] (!%p169_p3)   ;;  %v3134_v8 = vld [vmem:[%s3843_s1 + $0x60] sm:$0xff] (!%p169_p3)   ;;  %v3136_v10 = vld [vmem:[%s3843_s1 + $0x68] sm:$0xff] (!%p169_p3)   ;;  %vm677_vm3 = vcmask (!%p169_p3), 1042432   ;;  %vm678_vm4 = vcmask (!%p169_p3), 1046532  }
   0x9   : > { %2902 = vmatpush3.bf16.msra.mxu0 (!%p169_p3), %v3127_v1  ;;  %2807 = vmatprep.subr.bf16.mxu1 (!%p169_p3), %v3128_v2  ;;  %v3133_v7 = vld [vmem:[%s3843_s1 + $0x118] sm:$0xff] (!%p169_p3)   ;;  %v3135_v9 = vld [vmem:[%s3843_s1 + $0x120] sm:$0xff] (!%p169_p3)   ;;  %v3137_v14 = vld [vmem:[%s3843_s1 + $0x128] sm:$0xff] (!%p169_p3)  }
   0xa   : > { %2903 = vmatprep.subr.bf16.mxu0 (!%p169_p3), %v3129_v3  ;;  %v3138_v22 = vld [vmem:[%s3843_s1 + $0x70] sm:$0xff] (!%p169_p3)   ;;  %v3140_v37 = vld [vmem:[%s3843_s1 + $0x78] sm:$0xff] (!%p169_p3)   ;;  %vm3353_vm2 = vmor (!%p169_p3), %vm255_vm0, %vm256_vm1 }
   0xb   : > { %v3139_v23 = vld [vmem:[%s3843_s1 + $0x130] sm:$0xff] (!%p169_p3)   ;;  %v3141_v47 = vld [vmem:[%s3843_s1 + $0x138] sm:$0xff] (!%p169_p3)   ;;  %v3142_v63 = vld [vmem:[%s3843_s1] sm:$0xff] (!%p169_p3)  }
   0xc   : > { %2808 = vmatpush3.bf16.msra.mxu1 (!%p169_p3), %v3128_v2  ;;  %v3385_v1 = vld [vmem:[%s3843_s1 + $0x140] sm:$0xff] (!%p169_p3)   ;;  %vm3527_vm5 = vmor (!%p169_p3), %vm677_vm3, %vm678_vm4 }
   0xd   : > { %2904 = vmatpush3.bf16.msra.mxu0 (!%p169_p3), %v3129_v3  ;;  %2809 = vmatprep.subr.bf16.mxu1 (!%p169_p3), %v3130_v4  ;;  %v3206_v38 = vld [vmem:[%s3843_s1 + $0x220] sm:$0xff] (!%p169_p3)  }
   0xe   : > { %s3855_s12 = smov (!%p202_p4, %s3224_s12), 1  ;;  %2905 = vmatprep.subr.bf16.mxu0 %v3131_v5 }
   0xf   : > { %s3101_s5 = smul.u32 80, %s3855_s12 }
  0x10   : > { %2810 = vmatpush3.bf16.msra.mxu1 %v3130_v4 }
  0x11   : > { %2906 = vmatpush3.bf16.msra.mxu0 %v3131_v5  ;;  %2811 = vmatprep.subr.bf16.mxu1 %v3132_v6  ;;  %s3308_s16 = scalar_lea.vmem %s3842_s0, %s3101_s5  ;;  %s2673_s5 = sshll.u32 %s3855_s12, 5 }
  0x12   : > { %2907 = vmatprep.subr.bf16.mxu0 %v3133_v7  ;;  %v3314_v11 = vld [vmem:[%s3308_s16] sm:$0xf]  ;;  %v3317_v12 = vld [vmem:[%s3308_s16 + $0x8] sm:$0xf]  ;;  %v3320_v13 = vld [vmem:[%s3308_s16 + $0x4] sm:$0x1]  ;;  %s221_s8 = scalar_lea.vmem %s3845_s3, %s2673_s5 }
  0x13   : > { %v3326_v15 = vld [vmem:[%s3308_s16 + $0xc] sm:$0x1]  ;;  %v259_v16 = vshrl.u32 %v3314_v11, 16  ;;  %v262_v17 = vshll.u32 %v3314_v11, 16  ;;  %v268_v18 = vshll.u32 %v3320_v13, 16  ;;  %v273_v19 = vshrl.u32 %v3317_v12, 16 }
  0x14   : > { %2812 = vmatpush3.bf16.msra.mxu1 %v3132_v6  ;;  %v276_v20 = vshll.u32 %v3317_v12, 16  ;;  %v282_v21 = vshll.u32 %v3326_v15, 16  ;;  %v2458_v30 = vld [vmem:[%s3308_s16 + $0x8] sm:$0xf]  ;;  %v3342_v31 = vld [vmem:[%s3308_s16 + $0xc] sm:$0x1] }
  0x15   : > { %2908 = vmatpush3.bf16.msra.mxu0 %v3133_v7  ;;  %2813 = vmatprep.subr.bf16.mxu1 %v3134_v8  ;;  %v261_v24 = vrot.slane %v259_v16, 4  ;;  %v264_v25 = vrot.slane %v262_v17, 5  ;;  %v270_v26 = vrot.slane %v268_v18, 5  ;;  %v275_v27 = vrot.slane %v273_v19, 4  ;;  %v2460_v33 = vld [vmem:[%s3308_s16 + $0x10] sm:$0xf] }
  0x16   : > { %2909 = vmatprep.subr.bf16.mxu0 %v3135_v9  ;;  %v278_v28 = vrot.slane %v276_v20, 5  ;;  %v284_v29 = vrot.slane %v282_v21, 5  ;;  %v3346_v34 = vld [vmem:[%s3308_s16 + $0x14] sm:$0x1]  ;;  %v1054_v35 = vshrl.u32 %v2458_v30, 16  ;;  %v1057_v36 = vshll.u32 %v2458_v30, 16 }
  0x17   : > { %v265_v32 = vor.u32 %v264_v25, %v261_v24  ;;  %v1063_v40 = vshll.u32 %v3342_v31, 16  ;;  %v1068_v41 = vshrl.u32 %v2460_v33, 16  ;;  %v1071_v42 = vshll.u32 %v2460_v33, 16  ;;  %v3363_v51 = vld [vmem:[%s3308_s16 + $0x10] sm:$0xf] }
  0x18   : > { %2814 = vmatpush3.bf16.msra.mxu1 %v3134_v8  ;;  %v279_v39 = vor.u32 %v278_v28, %v275_v27  ;;  %v1056_v44 = vrot.slane %v1054_v35, 4  ;;  %v1059_v45 = vrot.slane %v1057_v36, 5  ;;  %v1077_v46 = vshll.u32 %v3346_v34, 16  ;;  %v3368_v55 = vld [vmem:[%s3308_s16 + $0x18] sm:$0xf] }
  0x19   : > { %2910 = vmatpush3.bf16.msra.mxu0 %v3135_v9  ;;  %2815 = vmatprep.subr.bf16.mxu1 %v3136_v10  ;;  %v266_v43 = vrot.slane %v265_v32, 4  ;;  %v1070_v49 = vrot.slane %v1068_v41, 4  ;;  %v1073_v50 = vrot.slane %v1071_v42, 5  ;;  %v1065_v54 = vrot.slane %v1063_v40, 5  ;;  %v3371_v56 = vld [vmem:[%s3308_s16 + $0x14] sm:$0x1] }
  0x1a   : > { %2911 = vmatprep.subr.bf16.mxu0 %v3137_v14  ;;  %v280_v48 = vrot.slane %v279_v39, 4  ;;  %v1060_v53 = vor.u32 %v1059_v45, %v1056_v44  ;;  %v1079_v59 = vrot.slane %v1077_v46, 5  ;;  %v3376_v60 = vld [vmem:[%s3308_s16 + $0x1c] sm:$0x1]  ;;  %v287_v61 = vshrl.u32 %v3363_v51, 16 }
  0x1b   : > { %v271_v52 = vsel %vm3353_vm2, %v266_v43, %v270_v26  ;;  %v1074_v58 = vor.u32 %v1073_v50, %v1070_v49  ;;  %v290_v2 = vshll.u32 %v3363_v51, 16  ;;  %v296_v3 = vshll.u32 %v3371_v56, 16  ;;  %v2462_v8 = vld [vmem:[%s3308_s16 + $0x18] sm:$0xf]  ;;  %v3396_v16 = vld [vmem:[%s3308_s16 + $0x1c] sm:$0x1] }
  0x1c   : > { %2816 = vmatpush3.bf16.msra.mxu1 %v3136_v10  ;;  %v285_v57 = vsel %vm3353_vm2, %v280_v48, %v284_v29  ;;  %v1061_v0 = vrot.slane %v1060_v53, 4  ;;  %v289_v5 = vrot.slane %v287_v61, 4  ;;  %v301_v6 = vshrl.u32 %v3368_v55, 16  ;;  %v2464_v17 = vld [vmem:[%s3308_s16 + $0x20] sm:$0xf]  ;;  %v3144_v43 = vld [vmem:[%s3843_s1 + $0x8] sm:$0xff]  }
  0x1d   : > { %2912 = vmatpush3.bf16.msra.mxu0 %v3137_v14  ;;  %2817 = vmatprep.subr.bf16.mxu1 %v3138_v22  ;;  %v2362_v62 = vcombine.low %v271_v52, %v285_v57  ;;  %v1075_v4 = vrot.slane %v1074_v58, 4  ;;  %v304_v7 = vshll.u32 %v3368_v55, 16  ;;  %v292_v10 = vrot.slane %v290_v2, 5  ;;  %v3402_v21 = vld [vmem:[%s3308_s16 + $0x24] sm:$0x1] }
  0x1e   : > { %2913 = vmatprep.subr.bf16.mxu0 %v3139_v23  ;;  %v1066_v9 = vsel %vm3353_vm2, %v1061_v0, %v1065_v54  ;;  %v310_v14 = vshll.u32 %v3376_v60, 16  ;;  %v303_v19 = vrot.slane %v301_v6, 4  ;;  %v298_v24 = vrot.slane %v296_v3, 5  ;;  %v3145_v54 = vld [vmem:[%s3843_s1 + $0x148] sm:$0xff]   ;;  %v3432_v0 = vld [vmem:[%s3308_s16 + $0x24] sm:$0x1] }
  0x1f   : > { %2821 = vmatprep.mubr.bf16.mxu1 %v2362_v62  ;;  %v1080_v18 = vsel %vm3353_vm2, %v1075_v4, %v1079_v59  ;;  %v306_v20 = vrot.slane %v304_v7, 5  ;;  %v1082_v27 = vshrl.u32 %v2462_v8, 16  ;;  %v1085_v28 = vshll.u32 %v2462_v8, 16  ;;  %v3146_v59 = vld [vmem:[%s3843_s1 + $0x10] sm:$0xff]   ;;  %v3426_v62 = vld [vmem:[%s3308_s16 + $0x20] sm:$0xf] }
  0x20   : > { %2818 = vmatpush3.bf16.msra.mxu1 %v3138_v22  ;;  %v2490_v22 = vcombine.low %v1066_v9, %v1080_v18  ;;  %v312_v25 = vrot.slane %v310_v14, 5  ;;  %v1091_v29 = vshll.u32 %v3396_v16, 16  ;;  %v1096_v32 = vshrl.u32 %v2464_v17, 16  ;;  %v3435_v2 = vld [vmem:[%s3308_s16 + $0x2c] sm:$0x1]  ;;  %v3147_v9 = vld [vmem:[%s3843_s1 + $0x150] sm:$0xff]  }
  0x21   : > { %2914 = vmatpush3.bf16.msra.mxu0 %v3139_v23  ;;  %2819 = vmatprep.subr.bf16.mxu1 %v3140_v37  ;;  %v293_v23 = vor.u32 %v292_v10, %v289_v5  ;;  %v307_v26 = vor.u32 %v306_v20, %v303_v19  ;;  %v1099_v33 = vshll.u32 %v2464_v17, 16  ;;  %v1105_v35 = vshll.u32 %v3402_v21, 16  ;;  %v3148_v10 = vld [vmem:[%s3843_s1 + $0x18] sm:$0xff]  }
  0x22   : > { %2915 = vmatprep.subr.bf16.mxu0 %v3141_v47  ;;  %2917 = vmatprep.mubr.bf16.mxu0 %v2490_v22  ;;  %v1087_v39 = vrot.slane %v1085_v28, 5  ;;  %v1098_v41 = vrot.slane %v1096_v32, 4  ;;  %v1093_v46 = vrot.slane %v1091_v29, 5  ;;  %v1345_v57 = vrot.slane %v3342_v31, 5  ;;  %v3149_v29 = vld [vmem:[%s3843_s1 + $0x158] sm:$0xff]  }
  0x23   : > { %v294_v30 = vrot.slane %v293_v23, 4  ;;  %v308_v36 = vrot.slane %v307_v26, 4  ;;  %v1101_v42 = vrot.slane %v1099_v33, 5  ;;  %v315_v3 = vshrl.u32 %v3426_v62, 16  ;;  %v2466_v23 = vld [vmem:[%s3308_s16 + $0x28] sm:$0xf] }
  0x24   : > { %2820 = vmatpush3.bf16.msra.mxu1 %v3140_v37  ;;  %v1084_v37 = vrot.slane %v1082_v27, 4  ;;  %v318_v4 = vshll.u32 %v3426_v62, 16  ;;  %v324_v5 = vshll.u32 %v3432_v0, 16  ;;  %v338_v8 = vshll.u32 %v3435_v2, 16  ;;  %v3456_v26 = vld [vmem:[%s3308_s16 + $0x34] sm:$0x1] }
  0x25   : > { %2916 = vmatpush3.bf16.msra.mxu0 %v3141_v47  ;;  %2829 = vmatprep.subr.bf16.mxu1 %v3142_v63  ;;  %v299_v40 = vsel %vm3353_vm2, %v294_v30, %v298_v24  ;;  %v313_v44 = vsel %vm3353_vm2, %v308_v36, %v312_v25  ;;  %v1107_v47 = vrot.slane %v1105_v35, 5  ;;  %v1102_v49 = vor.u32 %v1101_v42, %v1098_v41  ;;  %v3452_v24 = vld [vmem:[%s3308_s16 + $0x2c] sm:$0x1]  ;;  %v2468_v25 = vld [vmem:[%s3308_s16 + $0x30] sm:$0xf]  ;;  %v3150_v30 = vld [vmem:[%s3843_s1 + $0x20] sm:$0xff]  }
  0x26   : > { %2925 = vmatprep.subr.bf16.mxu0 %v3385_v1  ;;  %v1088_v45 = vor.u32 %v1087_v39, %v1084_v37  ;;  %v2363_v48 = vcombine.low %v299_v40, %v313_v44  ;;  %v317_v14 = vrot.slane %v315_v3, 4  ;;  %v320_v17 = vrot.slane %v318_v4, 5 }
  0x27   : > { %v1103_v52 = vrot.slane %v1102_v49, 4  ;;  %v326_v18 = vrot.slane %v324_v5, 5  ;;  %v340_v22 = vrot.slane %v338_v8, 5  ;;  %v1110_v27 = vshrl.u32 %v2466_v23, 16  ;;  %v2470_v5 = vld [vmem:[%s3308_s16 + $0x38] sm:$0xf] }
  0x28   : > { %v1089_v50 = vrot.slane %v1088_v45, 4  ;;  %2822 = vmatmul.mubr.bf16.vlgmr.msra.gmra.mrb[0].mxu1 %v2363_v48  ;;  %v1113_v28 = vshll.u32 %v2466_v23, 16  ;;  %v1119_v33 = vshll.u32 %v3452_v24, 16  ;;  %v1124_v35 = vshrl.u32 %v2468_v25, 16 }
  0x29   : > { %2830 = vmatpush3.bf16.msra.mxu1 %v3142_v63  ;;  %v1108_v58 = vsel %vm3353_vm2, %v1103_v52, %v1107_v47  ;;  %v3429_v63 = vld [vmem:[%s3308_s16 + $0x28] sm:$0xf]  ;;  %v1127_v36 = vshll.u32 %v2468_v25, 16  ;;  %v1112_v39 = vrot.slane %v1110_v27, 4  ;;  %v1133_v41 = vshll.u32 %v3456_v26, 16 }
  0x2a   : > { %v1094_v53 = vsel %vm3353_vm2, %v1089_v50, %v1093_v46  ;;  %2831 = vmatprep.subr.bf16.mxu1 %v3144_v43  ;;  %v329_v6 = vshrl.u32 %v3429_v63, 16  ;;  %v332_v7 = vshll.u32 %v3429_v63, 16  ;;  %v1115_v40 = vrot.slane %v1113_v28, 5  ;;  %v3467_v46 = vld [vmem:[%s3308_s16 + $0x30] sm:$0xf] }
  0x2b   : > { %v2491_v61 = vcombine.low %v1094_v53, %v1108_v58  ;;  %v1126_v44 = vrot.slane %v1124_v35, 4  ;;  %v1129_v45 = vrot.slane %v1127_v36, 5  ;;  %v1135_v49 = vrot.slane %v1133_v41, 5  ;;  %v3472_v50 = vld [vmem:[%s3308_s16 + $0x38] sm:$0xf] }
  0x2c   : > { %v331_v19 = vrot.slane %v329_v6, 4  ;;  %v334_v20 = vrot.slane %v332_v7, 5  ;;  %v1116_v48 = vor.u32 %v1115_v40, %v1112_v39  ;;  %v3475_v52 = vld [vmem:[%s3308_s16 + $0x34] sm:$0x1]  ;;  %v343_v53 = vshrl.u32 %v3467_v46, 16  ;;  %v3152_v6 = vld [vmem:[%s3843_s1 + $0x28] sm:$0xff]  }
  0x2d   : > { %2918 = vmatmul.mubr.bf16.vlgmr.msra.gmra.mrb[0].mxu0 %v2491_v61  ;;  %2832 = vmatpush3.bf16.msra.mxu1 %v3144_v43  ;;  %v1121_v43 = vrot.slane %v1119_v33, 5  ;;  %v3484_v61 = vld [vmem:[%s3308_s16 + $0x3c] sm:$0x1]  ;;  %v346_v3 = vshll.u32 %v3467_v46, 16  ;;  %v352_v4 = vshll.u32 %v3475_v52, 16  ;;  %v1138_v28 = vshrl.u32 %v2470_v5, 16 }
  0x2e   : > { %2926 = vmatpush3.bf16.msra.mxu0 %v3385_v1  ;;  %2833 = vmatprep.subr.bf16.mxu1 %v3146_v59  ;;  %v321_v1 = vor.u32 %v320_v17, %v317_v14  ;;  %v335_v32 = vor.u32 %v334_v20, %v331_v19  ;;  %v1117_v8 = vrot.slane %v1116_v48, 4  ;;  %v357_v14 = vshrl.u32 %v3472_v50, 16  ;;  %v3494_v17 = vld [vmem:[%s3308_s16 + $0x3c] sm:$0x1]  ;;  %v3502_v27 = vld [vmem:[%s3308_s16 + $0x44] sm:$0x1] }
  0x2f   : > { %2927 = vmatprep.subr.bf16.mxu0 %v3145_v54  ;;  %v348_v19 = vrot.slane %v346_v3, 5  ;;  %v354_v20 = vrot.slane %v352_v4, 5  ;;  %v366_v25 = vshll.u32 %v3484_v61, 16  ;;  %v1141_v36 = vshll.u32 %v2470_v5, 16 }
  0x30   : > { %v322_v37 = vrot.slane %v321_v1, 4  ;;  %v336_v42 = vrot.slane %v335_v32, 4  ;;  %v1122_v23 = vsel %vm3353_vm2, %v1117_v8, %v1121_v43  ;;  %v359_v1 = vrot.slane %v357_v14, 4 }
  0x31   : > { %2834 = vmatpush3.bf16.msra.mxu1 %v3146_v59  ;;  %v1130_v59 = vor.u32 %v1129_v45, %v1126_v44  ;;  %v368_v40 = vrot.slane %v366_v25, 5  ;;  %v1140_v41 = vrot.slane %v1138_v28, 4  ;;  %v1143_v45 = vrot.slane %v1141_v36, 5  ;;  %v2504_v25 = vld [vmem:[%s3308_s16 + $0x18] sm:$0xe] }
  0x32   : > { %2928 = vmatpush3.bf16.msra.mxu0 %v3145_v54  ;;  %2835 = vmatprep.subr.bf16.mxu1 %v3148_v10  ;;  %v327_v47 = vsel %vm3353_vm2, %v322_v37, %v326_v18  ;;  %v3151_v54 = vld [vmem:[%s3843_s1 + $0x160] sm:$0xff]   ;;  %v341_v58 = vsel %vm3353_vm2, %v336_v42, %v340_v22  ;;  %v360_v22 = vshll.u32 %v3472_v50, 16  ;;  %v3154_v37 = vld [vmem:[%s3843_s1 + $0x30] sm:$0xff]   ;;  %v1147_v42 = vshll.u32 %v3494_v17, 16  ;;  %v3157_v28 = vld [vmem:[%s3843_s1 + $0x178] sm:$0xff]  }
  0x33   : > { %2929 = vmatprep.subr.bf16.mxu0 %v3147_v9  ;;  %v2364_v7 = vcombine.low %v327_v47, %v341_v58  ;;  %v1131_v18 = vrot.slane %v1130_v59, 4  ;;  %v1349_v47 = vrot.slane %v3346_v34, 5  ;;  %v1353_v48 = vrot.slane %v3396_v16, 5  ;;  %v3155_v58 = vld [vmem:[%s3843_s1 + $0x170] sm:$0xff]  }
  0x34   : > { %v362_v35 = vrot.slane %v360_v22, 5  ;;  %v1144_v4 = vor.u32 %v1143_v45, %v1140_v41  ;;  %v1149_v34 = vrot.slane %v1147_v42, 5  ;;  %v1357_v22 = vrot.slane %v3402_v21, 5  ;;  %v3160_v41 = vld [vmem:[%s3843_s1 + $0x180] sm:$0xff]  }
  0x35   : > { %2836 = vmatpush3.bf16.msra.mxu1 %v3148_v10  ;;  %v345_v10 = vrot.slane %v343_v53, 4  ;;  %2825 = vmatprep.mubr.bf16.mxu1 %v2364_v7  ;;  %v1136_v32 = vsel %vm3353_vm2, %v1131_v18, %v1135_v49  ;;  %v1161_v53 = vshll.u32 %v3502_v27, 16  ;;  %v2502_v7 = vld [vmem:[%s3308_s16 + $0x8] sm:$0xe]  ;;  %v2512_v36 = vrot.slane %v2504_v25, 9 }
  0x36   : > { %2930 = vmatpush3.bf16.msra.mxu0 %v3147_v9  ;;  %2837 = vmatprep.subr.bf16.mxu1 %v3150_v30  ;;  %v2472_v9 = vld [vmem:[%s3308_s16 + $0x40] sm:$0xf]  ;;  %v2492_v39 = vcombine.low %v1122_v23, %v1136_v32  ;;  %v363_v44 = vor.u32 %v362_v35, %v359_v1  ;;  %v2510_v14 = vrot.slane %v2502_v7, 9  ;;  %v1145_v18 = vrot.slane %v1144_v4, 4 }
  0x37   : > { %2931 = vmatprep.subr.bf16.mxu0 %v3149_v29  ;;  %v349_v33 = vor.u32 %v348_v19, %v345_v10  ;;  %v1155_v49 = vshll.u32 %v2472_v9, 16  ;;  %v2503_v10 = vld [vmem:[%s3308_s16 + $0x10] sm:$0xe]  ;;  %v2374_v19 = vcombine.low %v3314_v11, %v3317_v12  ;;  %v1163_v1 = vrot.slane %v1161_v53, 5  ;;  %v2505_v12 = vld [vmem:[%s3308_s16 + $0x20] sm:$0xe] }
  0x38   : > { %2921 = vmatprep.mubr.bf16.mxu0 %v2492_v39  ;;  %v364_v3 = vrot.slane %v363_v44, 4  ;;  %v1346_v32 = vsel %vm3527_vm5, %v2510_v14, %v1345_v57  ;;  %v1150_v21 = vsel %vm3353_vm2, %v1145_v18, %v1149_v34  ;;  %v3159_v35 = vld [vmem:[%s3843_s1 + $0x80] sm:$0xff]   ;;  %v1354_v42 = vsel %vm3527_vm5, %v2512_v36, %v1353_v48  ;;  %v3164_v44 = vld [vmem:[%s3843_s1 + $0x90] sm:$0xff]  }
  0x39   : > { %2838 = vmatpush3.bf16.msra.mxu1 %v3150_v30  ;;  %v3153_v30 = vld [vmem:[%s3843_s1 + $0x168] sm:$0xff]   ;;  %v350_v43 = vrot.slane %v349_v33, 4  ;;  %v1157_v16 = vrot.slane %v1155_v49, 5  ;;  %v1361_v45 = vrot.slane %v3452_v24, 5  ;;  %v1369_v53 = vrot.slane %v3494_v17, 5  ;;  %v3168_v18 = vld [vmem:[%s3843_s1 + $0xa0] sm:$0xff]  }
  0x3a   : > { %2932 = vmatpush3.bf16.msra.mxu0 %v3149_v29  ;;  %2839 = vmatprep.subr.bf16.mxu1 %v3152_v6  ;;  %v1152_v29 = vshrl.u32 %v2472_v9, 16  ;;  %v1373_v24 = vrot.slane %v3502_v27, 5  ;;  %v686_v34 = vrot.slane %v3326_v15, 5  ;;  %v690_v17 = vrot.slane %v3371_v56, 5  ;;  %v654_v15 = vld [vmem:[%s3308_s16 + $0x8] sm:$0xe] }
  0x3b   : > { %2933 = vmatprep.subr.bf16.mxu0 %v3151_v54  ;;  %v355_v59 = vsel %vm3353_vm2, %v350_v43, %v354_v20  ;;  %v2511_v20 = vrot.slane %v2503_v10, 9  ;;  %v3162_v43 = vld [vmem:[%s3843_s1 + $0x88] sm:$0xff]   ;;  %v3165_v10 = vld [vmem:[%s3843_s1 + $0x190] sm:$0xff]   ;;  %v2387_v14 = vrot.slane %v654_v15, 9  ;;  %v698_v36 = vrot.slane %v3432_v0, 5  ;;  %v3178_v0 = vld [vmem:[%s3843_s1 + $0xc0] sm:$0xff]  }
  0x3c   : > { %v1154_v5 = vrot.slane %v1152_v29, 4  ;;  %v1365_v29 = vrot.slane %v3456_v26, 5  ;;  %v2377_v26 = vcombine.low %v3467_v46, %v3472_v50  ;;  %v3166_v46 = vld [vmem:[%s3843_s1 + $0x98] sm:$0xff]   ;;  %v3183_v15 = vld [vmem:[%s3843_s1 + $0x1c8] sm:$0xff]  }
  0x3d   : > { %2840 = vmatpush3.bf16.msra.mxu1 %v3152_v6  ;;  %v3156_v6 = vld [vmem:[%s3843_s1 + $0x38] sm:$0xff]   ;;  %v1350_v11 = vsel %vm3527_vm5, %v2511_v20, %v1349_v47 }
  0x3e   : > { %2934 = vmatpush3.bf16.msra.mxu0 %v3151_v54  ;;  %2841 = vmatprep.subr.bf16.mxu1 %v3154_v37  ;;  %v369_v54 = vsel %vm3353_vm2, %v364_v3, %v368_v40  ;;  %v1158_v23 = vor.u32 %v1157_v16, %v1154_v5  ;;  %v2534_v57 = vcombine.low %v1346_v32, %v1350_v11  ;;  %v653_v16 = vld [vmem:[%s3308_s16] sm:$0xe]  ;;  %v3167_v20 = vld [vmem:[%s3843_s1 + $0x198] sm:$0xff]  }
  0x3f   : > { %2935 = vmatprep.subr.bf16.mxu0 %v3153_v30  ;;  %v2365_v9 = vcombine.low %v355_v59, %v369_v54  ;;  %v2375_v40 = vcombine.low %v3363_v51, %v3368_v55  ;;  %v2376_v51 = vcombine.low %v3426_v62, %v3429_v63  ;;  %v682_v55 = vrot.slane %v3320_v13, 5  ;;  %v3163_v62 = vld [vmem:[%s3843_s1 + $0x188] sm:$0xff]   ;;  %v2507_v63 = vld [vmem:[%s3308_s16 + $0x30] sm:$0xe]  ;;  %v2509_v59 = vld [vmem:[%s3308_s16 + $0x40] sm:$0xe] }
  0x40   : > { %v1159_v33 = vrot.slane %v1158_v23, 4  ;;  %v2506_v13 = vld [vmem:[%s3308_s16 + $0x28] sm:$0xe]  ;;  %v2515_v49 = vrot.slane %v2507_v63, 9  ;;  %v2517_v7 = vrot.slane %v2509_v59, 9  ;;  %v2386_v56 = vrot.slane %v653_v16, 9 }
  0x41   : > { %2842 = vmatpush3.bf16.msra.mxu1 %v3154_v37  ;;  %v2513_v37 = vrot.slane %v2505_v12, 9  ;;  %v2514_v48 = vrot.slane %v2506_v13, 9  ;;  %v694_v54 = vrot.slane %v3376_v60, 5  ;;  %v655_v23 = vld [vmem:[%s3308_s16 + $0x10] sm:$0xe] }
  0x42   : > { %2936 = vmatpush3.bf16.msra.mxu0 %v3153_v30  ;;  %2826 = vmatmul.mubr.bf16.gmra.mrb[4].mxu1 %v2365_v9  ;;  %v1164_v31 = vsel %vm3353_vm2, %v1159_v33, %v1163_v1  ;;  %v1366_v4 = vsel %vm3527_vm5, %v2515_v49, %v1365_v29  ;;  %v687_v9 = vsel %vm3527_vm5, %v2387_v14, %v686_v34  ;;  %v656_v60 = vld [vmem:[%s3308_s16 + $0x18] sm:$0xe]  ;;  %v2388_v25 = vrot.slane %v655_v23, 9  ;;  %v3170_v33 = vld [vmem:[%s3843_s1 + $0xa8] sm:$0xff]  }
  0x43   : > { %2937 = vmatprep.subr.bf16.mxu0 %v3155_v58  ;;  %2843 = vmatprep.subr.bf16.mxu1 %v3156_v6  ;;  %v2493_v39 = vcombine.low %v1150_v21, %v1164_v31  ;;  %v1358_v30 = vsel %vm3527_vm5, %v2513_v37, %v1357_v22  ;;  %v1362_v3 = vsel %vm3527_vm5, %v2514_v48, %v1361_v45  ;;  %v3179_v32 = vld [vmem:[%s3308_s16 + $0x10] ss:$8 sps:$4 sm:$0xff]   ;;  %v706_v29 = vrot.slane %v3475_v52, 5  ;;  %v3182_v49 = vld [vmem:[%s3843_s1 + $0xc8] sm:$0xff]  }
  0x44   : > { %2845 = vmatprep.mubr.bf16.mxu1 %v2374_v19  ;;  %v2535_v47 = vcombine.low %v1354_v42, %v1358_v30  ;;  %v2536_v27 = vcombine.low %v1362_v3, %v1366_v4  ;;  %v683_v19 = vsel %vm3527_vm5, %v2386_v56, %v682_v55  ;;  %v691_v11 = vsel %vm3527_vm5, %v2388_v25, %v690_v17  ;;  %v3173_v31 = vld [vmem:[%s3843_s1 + $0xb0] sm:$0xff]   ;;  %v3176_v37 = vld [vmem:[%s3843_s1 + $0xb8] sm:$0xff]   ;;  %v2588_v25 = vld [vmem:[%s3308_s16 + $0x28] sm:$0xf] }
  0x45   : > { %2844 = vmatpush3.bf16.msra.mxu1 %v3156_v6  ;;  %2922 = vmatmul.mubr.bf16.gmra.mrb[4].mxu0 %v2493_v39  ;;  %v1374_v6 = vsel %vm3527_vm5, %v2517_v7, %v1373_v24  ;;  %v2410_v1 = vcombine.low %v683_v19, %v687_v9  ;;  %v657_v39 = vld [vmem:[%s3308_s16 + $0x20] sm:$0xe]  ;;  %v3177_v45 = vld [vmem:[%s3843_s1 + $0x1b8] sm:$0xff]   ;;  %v3666_v24 = vld [vmem:[%s3308_s16 + $0x14] sm:$0x1] }
  0x46   : > { %2938 = vmatpush3.bf16.msra.mxu0 %v3155_v58  ;;  %2853 = vmatprep.subr.bf16.mxu1 %v3159_v35  ;;  %v2508_v58 = vld [vmem:[%s3308_s16 + $0x38] sm:$0xe]  ;;  %v2390_v42 = vrot.slane %v657_v39, 9  ;;  %v1726_v59 = vshll.u32 %v3666_v24, 16  ;;  %v3181_v7 = vld [vmem:[%s3308_s16 + $0x20] ss:$8 sps:$4 sm:$0xff]  }
  0x47   : > { %2939 = vmatprep.subr.bf16.mxu0 %v3157_v28  ;;  %2941 = vmatprep.mubr.bf16.mxu0 %v2534_v57  ;;  %v2516_v5 = vrot.slane %v2508_v58, 9  ;;  %v3171_v57 = vld [vmem:[%s3843_s1 + $0x1a8] sm:$0xff]   ;;  %v2584_v52 = vld [vmem:[%s3308_s16 + $0x18] sm:$0xf]  ;;  %v3185_v9 = vld [vmem:[%s3843_s1 + $0x1d0] sm:$0xff]  }
  0x48   : > { %v1731_v3 = vshrl.u32 %v2584_v52, 16  ;;  %v1734_v4 = vshll.u32 %v2584_v52, 16  ;;  %v3192_v56 = vld [vmem:[%s3308_s16 + $0x30] ss:$8 sps:$4 sm:$0xff]   ;;  %v3191_v52 = vld [vmem:[%s3843_s1 + $0x1e8] sm:$0xff]  }
  0x49   : > { %v1370_v50 = vsel %vm3527_vm5, %v2516_v5, %v1369_v53  ;;  %v2582_v53 = vld [vmem:[%s3308_s16 + $0x10] sm:$0xf]  ;;  %v3186_v23 = vld [vmem:[%s3843_s1 + $0xd8] sm:$0xff]  }
  0x4a   : > { %2940 = vmatpush3.bf16.msra.mxu0 %v3157_v28  ;;  %2846 = vmatmul.mubr.bf16.vlgmr.msra.gmra.mrb[0].mxu1 %v2375_v40  ;;  %v2537_v22 = vcombine.low %v1370_v50, %v1374_v6  ;;  %v2389_v28 = vrot.slane %v656_v60, 9  ;;  %v658_v40 = vld [vmem:[%s3308_s16 + $0x28] sm:$0xe]  ;;  %v1720_v58 = vshll.u32 %v2582_v53, 16  ;;  %v1733_v50 = vrot.slane %v1731_v3, 4 }
  0x4b   : > { %2949 = vmatprep.subr.bf16.mxu0 %v3160_v41  ;;  %2854 = vmatpush3.bf16.msra.mxu1 %v3159_v35  ;;  %v3169_v35 = vld [vmem:[%s3843_s1 + $0x1a0] sm:$0xff]   ;;  %v2391_v30 = vrot.slane %v658_v40, 9  ;;  %v1736_v6 = vrot.slane %v1734_v4, 5 }
  0x4c   : > { %2855 = vmatprep.subr.bf16.mxu1 %v3162_v43  ;;  %2849 = vmatprep.mubr.bf16.mxu1 %v2376_v51  ;;  %v695_v12 = vsel %vm3527_vm5, %v2389_v28, %v694_v54  ;;  %v659_v51 = vld [vmem:[%s3308_s16 + $0x30] sm:$0xe]  ;;  %v1722_v16 = vrot.slane %v1720_v58, 5  ;;  %v1728_v54 = vrot.slane %v1726_v59, 5 }
  0x4d   : > { %2942 = vmatmul.mubr.bf16.vlgmr.msra.gmra.mrb[0].mxu0 %v2535_v47  ;;  %v2411_v21 = vcombine.low %v691_v11, %v695_v12  ;;  %v710_v47 = vrot.slane %v3484_v61, 5  ;;  %v2392_v63 = vrot.slane %v659_v51, 9  ;;  %v3670_v61 = vld [vmem:[%s3308_s16 + $0x1c] sm:$0x1]  ;;  %v3194_v11 = vld [vmem:[%s3308_s16 + $0x40] ss:$8 sps:$4 sm:$0xff]  }
  0x4e   : > { %2950 = vmatpush3.bf16.msra.mxu0 %v3160_v41  ;;  %2945 = vmatprep.mubr.bf16.mxu0 %v2536_v27  ;;  %v702_v41 = vrot.slane %v3435_v2, 5  ;;  %v699_v2 = vsel %vm3527_vm5, %v2390_v42, %v698_v36  ;;  %v1740_v5 = vshll.u32 %v3670_v61, 16  ;;  %v2590_v12 = vld [vmem:[%s3308_s16 + $0x30] sm:$0xf]  ;;  %v1762_v36 = vshll.u32 %v2588_v25, 16 }
  0x4f   : > { %2856 = vmatpush3.bf16.msra.mxu1 %v3162_v43  ;;  %2951 = vmatprep.subr.bf16.mxu0 %v3163_v62  ;;  %v3174_v43 = vld [vmem:[%s3843_s1 + $0x1b0] sm:$0xff]   ;;  %v707_v34 = vsel %vm3527_vm5, %v2392_v63, %v706_v29  ;;  %v1773_v40 = vshrl.u32 %v2590_v12, 16  ;;  %v3715_v51 = vld [vmem:[%s3308_s16 + $0x24] sm:$0x1] }
  0x50   : > { %2857 = vmatprep.subr.bf16.mxu1 %v3164_v44  ;;  %v703_v55 = vsel %vm3527_vm5, %v2391_v30, %v702_v41  ;;  %v1742_v19 = vrot.slane %v1740_v5, 5  ;;  %v1776_v41 = vshll.u32 %v2590_v12, 16  ;;  %v1764_v29 = vrot.slane %v1762_v36, 5  ;;  %v2596_v5 = vld [vmem:[%s3308_s16 + $0x48] sm:$0xf]  ;;  %v3197_v12 = vld [vmem:[%s3843_s1 + $0x1f8] sm:$0xff]  }
  0x51   : > { %v2412_v13 = vcombine.low %v699_v2, %v703_v55  ;;  %v3718_v2 = vld [vmem:[%s3308_s16 + $0x2c] sm:$0x1]  ;;  %v1754_v58 = vshll.u32 %v3715_v51, 16 }
  0x52   : > { %2850 = vmatmul.mubr.bf16.gmra.mrb[4].mxu1 %v2377_v26  ;;  %2952 = vmatpush3.bf16.msra.mxu0 %v3163_v62  ;;  %v3180_v62 = vld [vmem:[%s3843_s1 + $0x1c0] sm:$0xff]   ;;  %v1717_v26 = vshrl.u32 %v2582_v53, 16  ;;  %v1778_v63 = vrot.slane %v1776_v41, 5  ;;  %v1768_v59 = vshll.u32 %v3718_v2, 16 }
  0x53   : > { %2858 = vmatpush3.bf16.msra.mxu1 %v3164_v44  ;;  %2953 = vmatprep.subr.bf16.mxu0 %v3165_v10  ;;  %v660_v44 = vld [vmem:[%s3308_s16 + $0x38] sm:$0xe]  ;;  %v2594_v53 = vld [vmem:[%s3308_s16 + $0x40] sm:$0xf] }
  0x54   : > { %2859 = vmatprep.subr.bf16.mxu1 %v3166_v46  ;;  %2869 = vmatprep.mubr.bf16.mxu1 %v2410_v1  ;;  %v2393_v48 = vrot.slane %v660_v44, 9  ;;  %v1719_v27 = vrot.slane %v1717_v26, 4  ;;  %v2586_v1 = vld [vmem:[%s3308_s16 + $0x20] sm:$0xf]  ;;  %v3193_v26 = vld [vmem:[%s3843_s1 + $0xf0] sm:$0xff]  }
  0x55   : > { %2946 = vmatmul.mubr.bf16.gmra.mrb[4].mxu0 %v2537_v22 }
  0x56   : > { %2954 = vmatpush3.bf16.msra.mxu0 %v3165_v10  ;;  %2965 = vmatprep.mubr.bf16.mxu0 %v3179_v32  ;;  %v711_v17 = vsel %vm3527_vm5, %v2393_v48, %v710_v47  ;;  %v1723_v10 = vor.u32 %v1722_v16, %v1719_v27  ;;  %v3721_v47 = vld [vmem:[%s3308_s16 + $0x34] sm:$0x1]  ;;  %v1804_v27 = vshll.u32 %v2594_v53, 16 }
  0x57   : > { %2860 = vmatpush3.bf16.msra.mxu1 %v3166_v46  ;;  %2955 = vmatprep.subr.bf16.mxu0 %v3167_v20  ;;  %v3184_v46 = vld [vmem:[%s3843_s1 + $0xd0] sm:$0xff]   ;;  %v2413_v14 = vcombine.low %v707_v34, %v711_v17  ;;  %v1782_v3 = vshll.u32 %v3721_v47, 16  ;;  %v1801_v17 = vshrl.u32 %v2594_v53, 16  ;;  %v2627_v53 = vld [vmem:[%s3308_s16 + $0x18] sm:$0xe] }
  0x58   : > { %2861 = vmatprep.subr.bf16.mxu1 %v3168_v18  ;;  %v1724_v22 = vrot.slane %v1723_v10, 4 }
  0x5a   : > { %2956 = vmatpush3.bf16.msra.mxu0 %v3167_v20  ;;  %v3198_v20 = vld [vmem:[%s3308_s16 + $0x8] ss:$8 sps:$4 sm:$0xff]   ;;  %v1729_v28 = vsel %vm3353_vm2, %v1724_v22, %v1728_v54 }
  0x5b   : > { %2862 = vmatpush3.bf16.msra.mxu1 %v3168_v18  ;;  %2957 = vmatprep.subr.bf16.mxu0 %v3169_v35  ;;  %v1737_v18 = vor.u32 %v1736_v6, %v1733_v50  ;;  %v1815_v50 = vshrl.u32 %v2596_v5, 16  ;;  %v1818_v6 = vshll.u32 %v2596_v5, 16  ;;  %v2635_v5 = vrot.slane %v2627_v53, 9 }
  0x5c   : > { %2863 = vmatprep.subr.bf16.mxu1 %v3170_v33 }
  0x5d   : > { %v1738_v60 = vrot.slane %v1737_v18, 4  ;;  %v1770_v18 = vrot.slane %v1768_v59, 5  ;;  %v3203_v59 = vld [vmem:[%s3308_s16 + $0x38] ss:$8 sps:$4 sm:$0xff]  }
  0x5e   : > { %2958 = vmatpush3.bf16.msra.mxu0 %v3169_v35  ;;  %v1745_v35 = vshrl.u32 %v2586_v1, 16 }
  0x5f   : > { %2864 = vmatpush3.bf16.msra.mxu1 %v3170_v33  ;;  %2959 = vmatprep.subr.bf16.mxu0 %v3171_v57  ;;  %v1743_v32 = vsel %vm3353_vm2, %v1738_v60, %v1742_v19  ;;  %v3188_v33 = vld [vmem:[%s3843_s1 + $0xe0] sm:$0xff]   ;;  %v3748_v60 = vld [vmem:[%s3308_s16 + $0x4c] sm:$0x1] }
  0x60   : > { %2865 = vmatprep.subr.bf16.mxu1 %v3173_v31  ;;  %v2614_v39 = vcombine.low %v1729_v28, %v1743_v32  ;;  %v1747_v55 = vrot.slane %v1745_v35, 4  ;;  %v1817_v28 = vrot.slane %v1815_v50, 4  ;;  %v1820_v32 = vrot.slane %v1818_v6, 5  ;;  %v3199_v35 = vld [vmem:[%s3308_s16 + $0x18] ss:$8 sps:$4 sm:$0xff]   ;;  %v3207_v6 = vld [vmem:[%s3843_s1 + $0x228] sm:$0xff]  }
  0x62   : > { %2960 = vmatpush3.bf16.msra.mxu0 %v3171_v57  ;;  %v1759_v57 = vshrl.u32 %v2588_v25, 16  ;;  %v1806_v25 = vrot.slane %v1804_v27, 5 }
  0x63   : > { %2866 = vmatpush3.bf16.msra.mxu1 %v3173_v31  ;;  %2961 = vmatprep.subr.bf16.mxu0 %v3174_v43  ;;  %v1748_v31 = vshll.u32 %v2586_v1, 16  ;;  %v1803_v1 = vrot.slane %v1801_v17, 4 }
  0x64   : > { %2867 = vmatprep.subr.bf16.mxu1 %v3176_v37 }
  0x65   : > { %v1750_v44 = vrot.slane %v1748_v31, 5 }
  0x66   : > { %2962 = vmatpush3.bf16.msra.mxu0 %v3174_v43  ;;  %v3189_v43 = vld [vmem:[%s3843_s1 + $0x1e0] sm:$0xff]  }
  0x67   : > { %2868 = vmatpush3.bf16.msra.mxu1 %v3176_v37  ;;  %2963 = vmatprep.subr.bf16.mxu0 %v3177_v45  ;;  %v3187_v37 = vld [vmem:[%s3843_s1 + $0x1d8] sm:$0xff]  }
  0x68   : > { %2877 = vmatprep.subr.bf16.mxu1 %v3178_v0 }
  0x6a   : > { %2870 = vmatmul.mubr.bf16.vlgmr.msra.gmra.mrb[0].mxu1 %v2411_v21  ;;  %2964 = vmatpush3.bf16.msra.mxu0 %v3177_v45  ;;  %v2592_v21 = vld [vmem:[%s3308_s16 + $0x38] sm:$0xf]  ;;  %v1761_v45 = vrot.slane %v1759_v57, 4 }
  0x6b   : > { %2878 = vmatpush3.bf16.msra.mxu1 %v3178_v0  ;;  %2873 = vmatprep.mubr.bf16.mxu1 %v2412_v13  ;;  %v1787_v42 = vshrl.u32 %v2592_v21, 16  ;;  %v1790_v30 = vshll.u32 %v2592_v21, 16  ;;  %v3190_v0 = vld [vmem:[%s3843_s1 + $0xe8] sm:$0xff]   ;;  %v1775_v13 = vrot.slane %v1773_v40, 4  ;;  %v2630_v21 = vld [vmem:[%s3308_s16 + $0x30] sm:$0xe] }
  0x6c   : > { %2879 = vmatprep.subr.bf16.mxu1 %v3182_v49  ;;  %2973 = vmatprep.subr.bf16.mxu0 %v3180_v62  ;;  %v1765_v34 = vor.u32 %v1764_v29, %v1761_v45 }
  0x6d   : > { %2966 = vmatmul.mubr.bf16.vlgmr.msra.gmra.mrb[0].mxu0 %v3181_v7  ;;  %v1789_v48 = vrot.slane %v1787_v42, 4  ;;  %v1751_v7 = vor.u32 %v1750_v44, %v1747_v55  ;;  %v1779_v16 = vor.u32 %v1778_v63, %v1775_v13  ;;  %v1807_v42 = vor.u32 %v1806_v25, %v1803_v1 }
  0x6e   : > { %2974 = vmatpush3.bf16.msra.mxu0 %v3180_v62  ;;  %2969 = vmatprep.mubr.bf16.mxu0 %v3192_v56  ;;  %v3724_v62 = vld [vmem:[%s3308_s16 + $0x3c] sm:$0x1]  ;;  %v3195_v56 = vld [vmem:[%s3843_s1 + $0x1f0] sm:$0xff]   ;;  %v1766_v54 = vrot.slane %v1765_v34, 4  ;;  %v2024_v55 = vrot.slane %v3721_v47, 5  ;;  %v2016_v25 = vrot.slane %v3715_v51, 5 }
  0x6f   : > { %2880 = vmatpush3.bf16.msra.mxu1 %v3182_v49  ;;  %2975 = vmatprep.subr.bf16.mxu0 %v3183_v15  ;;  %v1792_v49 = vrot.slane %v1790_v30, 5  ;;  %v1796_v4 = vshll.u32 %v3724_v62, 16  ;;  %v1752_v10 = vrot.slane %v1751_v7, 4  ;;  %v1780_v19 = vrot.slane %v1779_v16, 4  ;;  %v3205_v16 = vld [vmem:[%s3843_s1 + $0x218] sm:$0xff]  }
  0x70   : > { %2881 = vmatprep.subr.bf16.mxu1 %v3184_v46  ;;  %v1771_v57 = vsel %vm3353_vm2, %v1766_v54, %v1770_v18  ;;  %v1821_v30 = vor.u32 %v1820_v32, %v1817_v28  ;;  %v2028_v45 = vrot.slane %v3724_v62, 5  ;;  %v2012_v7 = vrot.slane %v3670_v61, 5 }
  0x71   : > { %v2036_v54 = vrot.slane %v3748_v60, 5  ;;  %v2020_v32 = vrot.slane %v3718_v2, 5 }
  0x72   : > { %2874 = vmatmul.mubr.bf16.gmra.mrb[4].mxu1 %v2413_v14  ;;  %2976 = vmatpush3.bf16.msra.mxu0 %v3183_v15  ;;  %v3196_v15 = vld [vmem:[%s3843_s1 + $0xf8] sm:$0xff]   ;;  %v1756_v14 = vrot.slane %v1754_v58, 5  ;;  %v3204_v58 = vld [vmem:[%s3843_s1 + $0x210] sm:$0xff]   ;;  %v2013_v61 = vsel %vm3527_vm5, %v2635_v5, %v2012_v7 }
  0x73   : > { %2882 = vmatpush3.bf16.msra.mxu1 %v3184_v46  ;;  %2893 = vmatprep.mubr.bf16.mxu1 %v3198_v20  ;;  %v1793_v46 = vor.u32 %v1792_v49, %v1789_v48  ;;  %v1784_v20 = vrot.slane %v1782_v3, 5  ;;  %v2626_v49 = vld [vmem:[%s3308_s16 + $0x10] sm:$0xe] }
  0x74   : > { %2883 = vmatprep.subr.bf16.mxu1 %v3186_v23  ;;  %2977 = vmatprep.subr.bf16.mxu0 %v3185_v9  ;;  %v1757_v31 = vsel %vm3353_vm2, %v1752_v10, %v1756_v14  ;;  %v2634_v3 = vrot.slane %v2626_v49, 9  ;;  %v2633_v10 = vld [vmem:[%s3308_s16 + $0x48] sm:$0xe] }
  0x75   : > { %2970 = vmatmul.mubr.bf16.gmra.mrb[4].mxu0 %v3194_v11  ;;  %v1794_v22 = vrot.slane %v1793_v46, 4  ;;  %v3200_v11 = vld [vmem:[%s3843_s1 + $0x200] sm:$0xff]   ;;  %v1785_v40 = vsel %vm3353_vm2, %v1780_v19, %v1784_v20  ;;  %v2615_v29 = vcombine.low %v1757_v31, %v1771_v57  ;;  %v2641_v19 = vrot.slane %v2633_v10, 9  ;;  %v3209_v20 = vld [vmem:[%s3843_s1 + $0x238] sm:$0xff]  }
  0x76   : > { %2978 = vmatpush3.bf16.msra.mxu0 %v3185_v9  ;;  %2989 = vmatprep.mubr.bf16.mxu0 %v2614_v39  ;;  %v1798_v9 = vrot.slane %v1796_v4, 5  ;;  %v3202_v39 = vld [vmem:[%s3308_s16 + $0x28] ss:$8 sps:$4 sm:$0xff]   ;;  %v2008_v4 = vrot.slane %v3666_v24, 5 }
  0x77   : > { %2884 = vmatpush3.bf16.msra.mxu1 %v3186_v23  ;;  %2979 = vmatprep.subr.bf16.mxu0 %v3187_v37  ;;  %v3745_v23 = vld [vmem:[%s3308_s16 + $0x44] sm:$0x1] }
  0x78   : > { %2885 = vmatprep.subr.bf16.mxu1 %v3188_v33  ;;  %v1810_v36 = vshll.u32 %v3745_v23, 16  ;;  %v1799_v41 = vsel %vm3353_vm2, %v1794_v22, %v1798_v9  ;;  %v2009_v24 = vsel %vm3527_vm5, %v2634_v3, %v2008_v4  ;;  %v2032_v14 = vrot.slane %v3745_v23, 5  ;;  %v2628_v22 = vld [vmem:[%s3308_s16 + $0x20] sm:$0xe]  ;;  %v2629_v9 = vld [vmem:[%s3308_s16 + $0x28] sm:$0xe] }
  0x79   : > { %v2616_v13 = vcombine.low %v1785_v40, %v1799_v41  ;;  %v2658_v50 = vcombine.low %v2009_v24, %v2013_v61  ;;  %v2037_v23 = vsel %vm3527_vm5, %v2641_v19, %v2036_v54  ;;  %v2637_v28 = vrot.slane %v2629_v9, 9 }
  0x7a   : > { %2980 = vmatpush3.bf16.msra.mxu0 %v3187_v37  ;;  %v1824_v37 = vshll.u32 %v3748_v60, 16  ;;  %v1812_v63 = vrot.slane %v1810_v36, 5  ;;  %v2636_v60 = vrot.slane %v2628_v22, 9 }
  0x7b   : > { %2886 = vmatpush3.bf16.msra.mxu1 %v3188_v33  ;;  %2981 = vmatprep.subr.bf16.mxu0 %v3189_v43  ;;  %v2631_v33 = vld [vmem:[%s3308_s16 + $0x38] sm:$0xe] }
  0x7c   : > { %2887 = vmatprep.subr.bf16.mxu1 %v3190_v0  ;;  %v2639_v44 = vrot.slane %v2631_v33, 9  ;;  %v1826_v48 = vrot.slane %v1824_v37, 5 }
  0x7e   : > { %2982 = vmatpush3.bf16.msra.mxu0 %v3189_v43  ;;  %v3201_v43 = vld [vmem:[%s3843_s1 + $0x208] sm:$0xff]   ;;  %v2029_v62 = vsel %vm3527_vm5, %v2639_v44, %v2028_v45  ;;  %v2670_v44 = vld [vmem:[%s3844_s2] ss:$0 sm:$0xff] }
  0x7f   : > { %2888 = vmatpush3.bf16.msra.mxu1 %v3190_v0  ;;  %2983 = vmatprep.subr.bf16.mxu0 %v3191_v52  ;;  %v2638_v0 = vrot.slane %v2630_v21, 9  ;;  %v2021_v21 = vsel %vm3527_vm5, %v2637_v28, %v2020_v32 }
  0x80   : > { %2889 = vmatprep.subr.bf16.mxu1 %v3193_v26 }
  0x81   : > { %v2025_v47 = vsel %vm3527_vm5, %v2638_v0, %v2024_v55 }
  0x82   : > { %2984 = vmatpush3.bf16.msra.mxu0 %v3191_v52  ;;  %v1808_v52 = vrot.slane %v1807_v42, 4  ;;  %v2660_v34 = vcombine.low %v2025_v47, %v2029_v62 }
  0x83   : > { %2890 = vmatpush3.bf16.msra.mxu1 %v3193_v26  ;;  %2985 = vmatprep.subr.bf16.mxu0 %v3195_v56  ;;  %v1822_v26 = vrot.slane %v1821_v30, 4 }
  0x84   : > { %2891 = vmatprep.subr.bf16.mxu1 %v3196_v15  ;;  %v1813_v17 = vsel %vm3353_vm2, %v1808_v52, %v1812_v63 }
  0x85   : > { %v1827_v27 = vsel %vm3353_vm2, %v1822_v26, %v1826_v48 }
  0x86   : > { %2986 = vmatpush3.bf16.msra.mxu0 %v3195_v56  ;;  %v2617_v46 = vcombine.low %v1813_v17, %v1827_v27  ;;  %v2632_v56 = vld [vmem:[%s3308_s16 + $0x40] sm:$0xe] }
  0x87   : > { %2892 = vmatpush3.bf16.msra.mxu1 %v3196_v15  ;;  %2987 = vmatprep.subr.bf16.mxu0 %v3197_v12  ;;  %v3208_v15 = vld [vmem:[%s3843_s1 + $0x230] sm:$0xff]   ;;  %v2640_v18 = vrot.slane %v2632_v56, 9 }
  0x88   : > { %3021 = vmatprep.subr.bf16.mxu1 %v3200_v11 }
  0x89   : > { %v2033_v1 = vsel %vm3527_vm5, %v2640_v18, %v2032_v14 }
  0x8a   : > { %2894 = vmatmul.mubr.bf16.vlgmr.msra.gmra.mrb[0].mxu1 %v3199_v35  ;;  %2988 = vmatpush3.bf16.msra.mxu0 %v3197_v12  ;;  %v2017_v12 = vsel %vm3527_vm5, %v2636_v60, %v2016_v25 }
  0x8b   : > { %3029 = vmatpush3.bf16.msra.mxu1 %v3200_v11  ;;  %2897 = vmatprep.mubr.bf16.mxu1 %v3202_v39  ;;  %v2659_v33 = vcombine.low %v2017_v12, %v2021_v21 }
  0x8c   : > { %3022 = vmatprep.subr.bf16.mxu1 %v3201_v43  ;;  %2997 = vmatprep.subr.bf16.mxu0 %v3200_v11 }
  0x8d   : > { %2990 = vmatmul.mubr.bf16.vlgmr.msra.gmra.mrb[0].mxu0 %v2615_v29 }
  0x8e   : > { %2998 = vmatpush3.bf16.msra.mxu0 %v3200_v11  ;;  %2993 = vmatprep.mubr.bf16.mxu0 %v2616_v13  ;;  %v2661_v11 = vcombine.low %v2033_v1, %v2037_v23 }
  0x8f   : > { %3030 = vmatpush3.bf16.msra.mxu1 %v3201_v43  ;;  %2999 = vmatprep.subr.bf16.mxu0 %v3201_v43 }
  0x90   : > { %3023 = vmatprep.subr.bf16.mxu1 %v3204_v58 }
  0x92   : > { %2898 = vmatmul.mubr.bf16.gmra.mrb[4].mxu1 %v3203_v59  ;;  %3000 = vmatpush3.bf16.msra.mxu0 %v3201_v43 }
  0x93   : > { %3031 = vmatpush3.bf16.msra.mxu1 %v3204_v58  ;;  %3017 = vmatprep.mubr.bf16.mxu1 %v2660_v34 }
  0x94   : > { %3024 = vmatprep.subr.bf16.mxu1 %v3205_v16  ;;  %3001 = vmatprep.subr.bf16.mxu0 %v3204_v58 }
  0x95   : > { %2994 = vmatmul.mubr.bf16.gmra.mrb[4].mxu0 %v2617_v46 }
  0x96   : > { %3002 = vmatpush3.bf16.msra.mxu0 %v3204_v58  ;;  %3013 = vmatprep.mubr.bf16.mxu0 %v2658_v50 }
  0x97   : > { %3032 = vmatpush3.bf16.msra.mxu1 %v3205_v16  ;;  %3003 = vmatprep.subr.bf16.mxu0 %v3205_v16 }
  0x98   : > { %3025 = vmatprep.subr.bf16.mxu1 %v3206_v38 }
  0x9a   : > { %3004 = vmatpush3.bf16.msra.mxu0 %v3205_v16 }
  0x9b   : > { %3033 = vmatpush3.bf16.msra.mxu1 %v3206_v38  ;;  %3005 = vmatprep.subr.bf16.mxu0 %v3206_v38 }
  0x9c   : > { %3026 = vmatprep.subr.bf16.mxu1 %v3207_v6 }
  0x9e   : > { %3006 = vmatpush3.bf16.msra.mxu0 %v3206_v38 }
  0x9f   : > { %3034 = vmatpush3.bf16.msra.mxu1 %v3207_v6  ;;  %3007 = vmatprep.subr.bf16.mxu0 %v3207_v6 }
  0xa0   : > { %3027 = vmatprep.subr.bf16.mxu1 %v3208_v15 }
  0xa2   : > { %3008 = vmatpush3.bf16.msra.mxu0 %v3207_v6 }
  0xa3   : > { %3035 = vmatpush3.bf16.msra.mxu1 %v3208_v15  ;;  %3009 = vmatprep.subr.bf16.mxu0 %v3208_v15 }
  0xa4   : > { %3028 = vmatprep.subr.bf16.mxu1 %v3209_v20 }
  0xa6   : > { %3010 = vmatpush3.bf16.msra.mxu0 %v3208_v15 }
  0xa7   : > { %3036 = vmatpush3.bf16.msra.mxu1 %v3209_v20  ;;  %3011 = vmatprep.subr.bf16.mxu0 %v3209_v20 }
  0xaa   : > { %3018 = vmatmul.mubr.bf16.vlgmr.msra.gmra.mrb[8].mxu1 %v2661_v11  ;;  %3012 = vmatpush3.bf16.msra.mxu0 %v3209_v20 }
  0xad   : > { %3014 = vmatmul.mubr.bf16.vlgmr.msra.gmra.mrb[0].mxu0 %v2659_v33 }
 0x15d   : > { %v2895_v35 = vpop.f32.mrb[0].mxu1 }
 0x15e   : > { %v998_v51 = vpop.f32.mrb[1].mxu1 }
 0x15f   : > { %v2896_v31 = vpop.f32.mrb[2].mxu1 }
 0x160   : > { %v1001_v57 = vpop.f32.mrb[3].mxu1 }
 0x165   : > { %v2899_v2 = vpop.f32.mrb[4].mxu1 }
 0x166   : > { %v1014_v36 = vpop.f32.mrb[5].mxu1 }
 0x167   : > { %v2900_v37 = vpop.f32.mrb[6].mxu1 }
 0x168   : > { %v1017_v39 = vpop.f32.mrb[7].mxu1  ;;  %v2995_v40 = vpop.f32.mrb[4].mxu0 }
 0x169   : > { %v3041_v41 = vadd.f32 %v2995_v40, %v2899_v2  ;;  %v1959_v42 = vpop.f32.mrb[5].mxu0 }
 0x16a   : > { %v3043_v30 = vadd.f32 %v1959_v42, %v1014_v36  ;;  %v2996_v43 = vpop.f32.mrb[6].mxu0 }
 0x16b   : > { %v3045_v8 = vadd.f32 %v2996_v43, %v2900_v37  ;;  %v1962_v0 = vpop.f32.mrb[7].mxu0 }
 0x16c   : > { %v3047_v55 = vadd.f32 %v1962_v0, %v1017_v39 }
 0x17d   : > { %v3019_v45 = vpop.f32.mrb[8].mxu1 }
 0x17e   : > { %v3042_v29 = vadd.f32 %v3041_v41, %v3019_v45  ;;  %v2169_v13 = vpop.f32.mrb[9].mxu1 }
 0x17f   : > { %v3044_v63 = vadd.f32 %v3043_v30, %v2169_v13  ;;  %v3020_v48 = vpop.f32.mrb[10].mxu1 }
 0x180   : > { %v2205_v49 = vadd.f32 %v3042_v29, %v2670_v44  ;;  %v3046_v53 = vadd.f32 %v3045_v8, %v3020_v48  ;;  %v2172_v52 = vpop.f32.mrb[11].mxu1  ;;  %v3015_v62 = vpop.f32.mrb[0].mxu0 }
 0x181   : > { %v2203_v26 = vadd.f32 %v3044_v63, %v2670_v44  ;;  %v3048_v47 = vadd.f32 %v3047_v55, %v2172_v52  ;;  %v3037_v59 = vadd.f32 %v3015_v62, %v2895_v35  ;;  %v2153_v3 = vpop.f32.mrb[1].mxu0 }
 0x182   : > { %v2206_v58 = vadd.f32 %v3046_v53, %v2670_v44  ;;  %v2213_v5 = vmax.f32 %v2205_v49, 0.0  ;;  %v3038_v7 = vadd.f32 %v2153_v3, %v998_v51  ;;  %v3016_v34 = vpop.f32.mrb[2].mxu0 }
 0x183   : > { %v2204_v4 = vadd.f32 %v3048_v47, %v2670_v44  ;;  %v2201_v27 = vadd.f32 %v3037_v59, %v2670_v44  ;;  %v2211_v16 = vmax.f32 %v2203_v26, 0.0  ;;  %v3039_v24 = vadd.f32 %v3016_v34, %v2896_v31  ;;  %v2156_v61 = vpop.f32.mrb[3].mxu0 }
 0x184   : > { %v2214_v17 = vmax.f32 %v2206_v58, 0.0  ;;  %v2199_v38 = vadd.f32 %v3038_v7, %v2670_v44  ;;  %v3040_v6 = vadd.f32 %v2156_v61, %v1001_v57 }
 0x185   : > { %v2212_v46 = vmax.f32 %v2204_v4, 0.0  ;;  %v2202_v15 = vadd.f32 %v3039_v24, %v2670_v44  ;;  %v2209_v14 = vmax.f32 %v2201_v27, 0.0 }
 0x186   : > { %v2692_v50 = vpack.c.bf16 %v2214_v17, %v2213_v5  ;;  %v2200_v10 = vadd.f32 %v3040_v6, %v2670_v44  ;;  %v2207_v18 = vmax.f32 %v2199_v38, 0.0 }
 0x187   : > { %v2687_v56 = vpack.c.bf16 %v2212_v46, %v2211_v16  ;;  %v2210_v54 = vmax.f32 %v2202_v15, 0.0 }
 0x188   : > { %2696 = vst [vmem:[%s221_s8 + $0x18] sm:$0xff] %v2692_v50   ;;  %v2208_v19 = vmax.f32 %v2200_v10, 0.0 }
 0x189   : > { %2695 = vst [vmem:[%s221_s8 + $0x10] sm:$0xff] %v2687_v56   ;;  %v2682_v20 = vpack.c.bf16 %v2210_v54, %v2209_v14 }
 0x18a   : > { %v2677_v22 = vpack.c.bf16 %v2208_v19, %v2207_v18 }
 0x18b   : > { %2694 = vst [vmem:[%s221_s8 + $0x8] sm:$0xff] %v2682_v20  }
 0x18c   : > { %2678 = vst [vmem:[%s221_s8] sm:$0xff] %v2677_v22  }
 0x18d PF: > { %s13_s14 = sadd.s32 1, %s3232_s14   ;;  %s3850_s12 = smov %s3228_s13 }
 0x18e   : > { %p10_p5 = scmp.ge.s32.totalorder %s13_s14, 4   ;;  %s3851_s13 = smov %s3853_s15 }
 0x190   :  { %12 = sbr.rel (!%p10_p5) target bundleno = 2 (0x2), region = 78 }

</bundles_post_ra>
